<compile_context>
chip_gen: v6e
topology: v6e:2x2x1
jax: 0.10.0
libtpu: 0.0.40
codegen_flags: <defaults>
</compile_context>

<pallas_src>
import functools

import jax
import jax.numpy as jnp
from jax.experimental import pallas as pl
from jax.experimental.pallas import tpu as pltpu


def _cdiv(a, b):
    return (a + b - 1) // b


def _round_up(x, m):
    return ((x + m - 1) // m) * m


def _detect_vmem_limit():
    cap = 128 * 1024 * 1024
    try:
        info = pltpu.get_tpu_info()
        cap = int(getattr(info, "vmem_capacity_bytes", cap))
    except Exception:
        pass
    # ~48 MiB on v7x (64 MiB physical), 96 MiB on v5e/v6e (128 MiB physical).
    return max(32 * 1024 * 1024, min(int(cap * 3 // 4), 96 * 1024 * 1024))


VMEM_LIMIT = _detect_vmem_limit()
FLAT_CONV_VMEM_BUDGET = int(VMEM_LIMIT * 3 // 4)

# Set by the probes in __main__; correct (slower) fallbacks used when False.
USE_PALLAS_MATMUL = True
USE_MATMUL_FOLD = True
USE_FLAT_CONV = True
USE_FLAT_FOLD = True
FLAT_SINGLE_BUF = True


# ----------------------------------------------------------------------------
# Pallas kernel 1: out = maybe_relu((A @ B) * scale + bias)
# A/B are bf16 MXU operands, accumulation and epilogue in f32.
# When `fold` is set the (tm, N<128) tile is stored lane-dense as
# (tm*N/128, 128) (bit-identical row-major reinterpretation).
# ----------------------------------------------------------------------------
def _matmul_kernel(a_ref, b_ref, s_ref, c_ref, o_ref, acc_ref, *, relu, fold):
    @pl.when(pl.program_id(2) == 0)
    def _():
        acc_ref[...] = jnp.zeros_like(acc_ref)

    acc_ref[...] += jnp.dot(a_ref[...], b_ref[...],
                            preferred_element_type=jnp.float32)

    @pl.when(pl.program_id(2) == pl.num_programs(2) - 1)
    def _():
        y = acc_ref[...] * s_ref[...] + c_ref[...]
        if relu:
            y = jnp.maximum(y, 0.0)
        y = y.astype(o_ref.dtype)
        if fold:
            y = y.reshape(o_ref.shape)
        o_ref[...] = y


def matmul_scale_bias(a, b, scale, bias, relu=True, out_dtype=jnp.bfloat16):
    """a: (M, K), b: (K, N), scale/bias: (N,).  Returns (M, N) in out_dtype."""
    M, K = a.shape
    K2, N = b.shape
    assert K == K2
    scale2 = scale.reshape(1, N).astype(jnp.float32)
    bias2 = bias.reshape(1, N).astype(jnp.float32)

    # Tiny matmuls: pallas_call launch / per-step overhead dominates.
    if (not USE_PALLAS_MATMUL) or M < 128 or N < 16 or K < 16:
        y = jnp.dot(a.astype(jnp.float32), b.astype(jnp.float32)) * scale2 + bias2
        if relu:
            y = jnp.maximum(y, 0.0)
        return y.astype(out_dtype)

    a = a.astype(jnp.bfloat16)
    b = b.astype(jnp.bfloat16)

    # Tiles: large M tiles (amortize per-step overhead), lane-dense N tiles,
    # K resident when small enough.
    tm = min(1024, (M // 128) * 128)
    if N % 512 == 0:
        tn = 512
    elif N % 256 == 0:
        tn = 256
    elif N % 128 == 0:
        tn = 128
    elif N > 128:
        tn = 128                 # ragged N edge handled by the pipeline
    else:
        tn = N
    if K <= 2048:
        tk = K
    else:
        tk = next((t for t in (1024, 512, 384, 256, 128) if K % t == 0), 0)
        if tk == 0:
            tk = 512
            pad = (-K) % tk
            a = jnp.pad(a, ((0, 0), (0, pad)))   # zero K-pad: exact
            b = jnp.pad(b, ((0, pad), (0, 0)))
            K = K + pad

    # Lane-folded output for narrow N (full-lane vst instead of vst.msk).
    fold = (USE_MATMUL_FOLD and N < 128 and tn == N and N % 8 == 0
            and (M * N) % 128 == 0)
    grid = (_cdiv(M, tm), _cdiv(N, tn), K // tk)
    if fold:
        fold_rows = tm * N // 128
        out_shape = jax.ShapeDtypeStruct((M * N // 128, 128), out_dtype)
        out_spec = pl.BlockSpec((fold_rows, 128), lambda i, j, k: (i, 0))
    else:
        out_shape = jax.ShapeDtypeStruct((M, N), out_dtype)
        out_spec = pl.BlockSpec((tm, tn), lambda i, j, k: (i, j))

    cost = pl.CostEstimate(
        flops=int(2 * M * N * K), transcendentals=0,
        bytes_accessed=int(M * K * 2 + K * N * 2 +
                           M * N * jnp.dtype(out_dtype).itemsize))
    out = pl.pallas_call(
        functools.partial(_matmul_kernel, relu=relu, fold=fold),
        out_shape=out_shape,
        grid_spec=pltpu.PrefetchScalarGridSpec(
            num_scalar_prefetch=0,
            grid=grid,
            in_specs=[
                pl.BlockSpec((tm, tk), lambda i, j, k: (i, k)),
                pl.BlockSpec((tk, tn), lambda i, j, k: (k, j)),
                pl.BlockSpec((1, tn), lambda i, j, k: (0, j)),
                pl.BlockSpec((1, tn), lambda i, j, k: (0, j)),
            ],
            out_specs=out_spec,
            scratch_shapes=[pltpu.VMEM((tm, tn), jnp.float32)],
        ),
        compiler_params=pltpu.CompilerParams(
            dimension_semantics=("parallel", "parallel", "arbitrary"),
            vmem_limit_bytes=VMEM_LIMIT),
        cost_estimate=cost,
    )(a, b, scale2, bias2)
    if fold:
        out = out.reshape(M, N)
    return out


# ----------------------------------------------------------------------------
# Pallas kernel 2: im2col-free "same" 3x3 conv (stride 1, padding == dilation)
# fused with folded-BN scale/bias and ReLU.  The padded image is flattened to
# (pixels, Cin); each of the 9 taps is a constant shift in flat pixel index, so
# the conv is 9 shifted bf16 matmuls accumulated in f32.  Only the H valid
# padded rows are computed (rows_out = H * Wp), tiled along a row grid axis.
# ----------------------------------------------------------------------------
def _conv3x3_flat_kernel(x_ref, w_ref, s_ref, c_ref, o_ref, *, offs, trows,
                         fold, relu):
    # x_ref: (1, length, Cin) bf16 (zero-padded flattened image + margins)
    # w_ref: (9, Cin, TCout) bf16 ; s_ref/c_ref: (1, TCout) f32
    base = pl.multiple_of(pl.program_id(2) * trows, 8)
    acc = None
    for t, off in enumerate(offs):
        a = x_ref[0, pl.ds(base + off, trows), :]            # bf16, no copies
        part = jnp.dot(a, w_ref[t], preferred_element_type=jnp.float32)
        acc = part if acc is None else acc + part
    y = acc * s_ref[...] + c_ref[...]
    if relu:
        y = jnp.maximum(y, 0.0)
    y = y.astype(o_ref.dtype)
    if fold:
        y = y.reshape(o_ref.shape[1], o_ref.shape[2])         # lane-dense store
    o_ref[0, :, :] = y


def _flat_vmem_bytes(length, cin, trows, tcout, bufs):
    cin_l = _round_up(max(cin, 1), 128)
    tco_l = _round_up(max(tcout, 1), 128)
    x_b = bufs * _round_up(length, 16) * cin_l * 2
    w_b = 2 * 9 * _round_up(cin, 16) * tco_l * 2
    o_b = 2 * _round_up(trows, 16) * tco_l * 2
    acc_b = _round_up(trows, 8) * tco_l * 4
    tap_b = 2 * _round_up(trows, 16) * cin_l * 2
    return x_b + w_b + o_b + acc_b + tap_b


def _plan_flat(h, w, cin, cout, d, fold=None, single_buffer=None):
    if fold is None:
        fold = USE_FLAT_FOLD
    fold = bool(fold and cout < 128 and 128 % cout == 0)
    if single_buffer is None:
        single_buffer = FLAT_SINGLE_BUF
    hp, wp = h + 2 * d, w + 2 * d
    rows_out = h * wp                       # valid padded rows only
    if cout <= 256:
        tcout = cout
    elif cout % 256 == 0:
        tcout = 256
    elif cout % 128 == 0:
        tcout = 128
    else:
        tcout = cout
    granule = max(8, 1024 // cout) if fold else 8
    g = max(1, _cdiv(rows_out, 1024))
    trows = _round_up(_cdiv(rows_out, g), granule)
    g = _cdiv(rows_out, trows)
    rows_pad = g * trows
    m0 = d
    m1 = (rows_pad - rows_out) + d + 8
    length = m0 + hp * wp + m1
    offs = tuple(m0 + kh * d * wp + (kw - 1) * d
                 for kh in range(3) for kw in range(3))
    bufs = 1 if single_buffer else 2
    vmem = _flat_vmem_bytes(length, cin, trows, tcout, bufs)
    return dict(hp=hp, wp=wp, rows_out=rows_out, rows_pad=rows_pad, trows=trows,
                g=g, tcout=tcout, fold=fold, single_buffer=single_buffer,
                m0=m0, m1=m1, length=length, offs=offs, vmem=vmem)


def conv3x3_same_flat(x, w9, scale, bias, *, dilation=1, relu=True,
                      fold=None, single_buffer=None):
    """x: (N, H, W, Cin); w9: (9, Cin, Cout) ordered (kh, kw)."""
    n, h, w, cin = x.shape
    cout = w9.shape[-1]
    d = dilation
    assert d >= 1
    P = _plan_flat(h, w, cin, cout, d, fold=fold, single_buffer=single_buffer)
    hp, wp = P["hp"], P["wp"]
    trows, tcout, g_tiles = P["trows"], P["tcout"], P["g"]

    xp = jnp.pad(x.astype(jnp.bfloat16), ((0, 0), (d, d), (d, d), (0, 0)))
    xm = jnp.pad(xp.reshape(n, hp * wp, cin), ((0, 0), (P["m0"], P["m1"]), (0, 0)))

    kern = functools.partial(_conv3x3_flat_kernel, offs=P["offs"], trows=trows,
                             fold=P["fold"], relu=relu)

    x_spec_kwargs = {}
    if P["single_buffer"]:
        # The x block index only changes with the batch axis -> single buffer.
        x_spec_kwargs["pipeline_mode"] = pl.Buffered(1)
    x_spec = pl.BlockSpec((1, P["length"], cin), lambda b, j, g: (b, 0, 0),
                          **x_spec_kwargs)

    if P["fold"]:
        fold_rows = trows * cout // 128
        out_shape = jax.ShapeDtypeStruct((n, g_tiles * fold_rows, 128),
                                         jnp.bfloat16)
        out_spec = pl.BlockSpec((1, fold_rows, 128), lambda b, j, g: (b, g, 0))
    else:
        out_shape = jax.ShapeDtypeStruct((n, P["rows_pad"], cout), jnp.bfloat16)
        out_spec = pl.BlockSpec((1, trows, tcout), lambda b, j, g: (b, g, j))

    cost = pl.CostEstimate(
        flops=int(2 * 9 * n * P["rows_pad"] * cin * cout), transcendentals=0,
        bytes_accessed=int(n * P["length"] * cin * 2 + 9 * cin * cout * 2 +
                           n * P["rows_pad"] * cout * 2))
    out = pl.pallas_call(
        kern,
        out_shape=out_shape,
        grid_spec=pltpu.PrefetchScalarGridSpec(
            num_scalar_prefetch=0,
            grid=(n, _cdiv(cout, tcout), g_tiles),
            in_specs=[
                x_spec,
                pl.BlockSpec((9, cin, tcout), lambda b, j, g: (0, 0, j)),
                pl.BlockSpec((1, tcout), lambda b, j, g: (0, j)),
                pl.BlockSpec((1, tcout), lambda b, j, g: (0, j)),
            ],
            out_specs=out_spec),
        compiler_params=pltpu.CompilerParams(
            dimension_semantics=("parallel", "parallel", "parallel"),
            vmem_limit_bytes=VMEM_LIMIT),
        cost_estimate=cost,
    )(xm, w9.astype(jnp.bfloat16),
      scale.reshape(1, cout).astype(jnp.float32),
      bias.reshape(1, cout).astype(jnp.float32))

    if P["fold"]:
        out = out.reshape(n, P["rows_pad"], cout)
    out = out[:, :P["rows_out"], :].reshape(n, h, wp, cout)
    return out[:, :, d:d + w, :]          # drop left/right column halo only


# ----------------------------------------------------------------------------
# Conv2d dispatcher (NHWC)
# ----------------------------------------------------------------------------
def _xla_conv3x3(x, w9, scale, bias, *, dilation, relu, out_dtype):
    cin = x.shape[-1]
    wk = w9.reshape(3, 3, cin, -1).astype(jnp.bfloat16)
    y = jax.lax.conv_general_dilated(
        x.astype(jnp.bfloat16), wk, window_strides=(1, 1),
        padding=((dilation, dilation), (dilation, dilation)),
        rhs_dilation=(dilation, dilation),
        dimension_numbers=("NHWC", "HWIO", "NHWC"),
        preferred_element_type=jnp.float32)
    y = y * scale.reshape(1, 1, 1, -1) + bias.reshape(1, 1, 1, -1)
    if relu:
        y = jnp.maximum(y, 0.0)
    return y.astype(out_dtype)


def _flat_conv_ok(h, w, cin, cout, d):
    if not USE_FLAT_CONV:
        return False
    # Tiny-channel / tiny-spatial convs: MXU and lanes mostly idle -> XLA.
    if cin < 16 or cout < 16 or cin * cout < 1024:
        return False
    if h * (w + 2 * d) < 256:
        return False
    return _plan_flat(h, w, cin, cout, d)["vmem"] <= FLAT_CONV_VMEM_BUDGET


def conv2d(x, w_mat, scale, bias, *, k=3, padding=0, dilation=1, relu=True,
           out_dtype=jnp.bfloat16):
    """x: (N, H, W, Cin); w_mat: (k*k*Cin, Cout) ordered (kh, kw, Cin)."""
    n, h, w, cin = x.shape
    cout = w_mat.shape[-1]
    if k == 1:
        y = matmul_scale_bias(x.reshape(n * h * w, cin), w_mat, scale, bias,
                              relu=relu, out_dtype=out_dtype)
        return y.reshape(n, h, w, cout)

    assert k == 3 and padding == dilation, "only 'same' 3x3 convs in this net"
    w9 = w_mat.reshape(9, cin, cout)
    d = dilation
    if _flat_conv_ok(h, w, cin, cout, d):
        return conv3x3_same_flat(x, w9, scale, bias, dilation=d, relu=relu)
    # TODO(synk): tile the flat conv's input rows with a halo DMA so the Pallas
    # path also covers very large images instead of falling back to XLA here.
    return _xla_conv3x3(x, w9, scale, bias, dilation=d, relu=relu,
                        out_dtype=out_dtype)


# ----------------------------------------------------------------------------
# Deterministic parameter initialization (BN folded into scale/bias)
# ----------------------------------------------------------------------------
class ParamGen:
    def __init__(self, key):
        self._key = key

    def normal(self, shape, std=0.1):
        self._key, k = jax.random.split(self._key)
        return std * jax.random.normal(k, shape, jnp.float32)


def make_conv_bn(pg, cin, cout, k, conv_bias=False, bn=True):
    w = pg.normal((k * k * cin, cout), std=(k * k * cin) ** -0.5)
    b = pg.normal((cout,)) if conv_bias else jnp.zeros((cout,), jnp.float32)
    if bn:
        gamma = 1.0 + pg.normal((cout,))
        beta = pg.normal((cout,))
        mean = pg.normal((cout,))
        var = 1.0 + jnp.abs(pg.normal((cout,)))
        s = gamma * jax.lax.rsqrt(var + 1e-5)
        bias = beta + (b - mean) * s
    else:
        s = jnp.ones((cout,), jnp.float32)
        bias = b
    return {"w": w, "scale": s, "bias": bias}


def init_unet_dspp(key):
    pg = ParamGen(key)
    f = [32, 64, 128, 256, 512]

    def conv_block_params(cin, cout):
        return {"c1": make_conv_bn(pg, cin, cout, 3, conv_bias=True),
                "c2": make_conv_bn(pg, cout, cout, 3, conv_bias=True)}

    def dspp_params(cin, out_ch):
        oc = [s * (cin // 16) for s in (8, 4, 2, 1, 1)]
        return {
            "oc": oc,
            "rates": (6, 12, 18),
            "b0": make_conv_bn(pg, oc[0], oc[0], 3),   # ASPPConv dil 6
            "b1": make_conv_bn(pg, oc[1], oc[1], 3),   # ASPPConv dil 12
            "b2": make_conv_bn(pg, oc[2], oc[2], 3),   # ASPPConv dil 18
            "b3": make_conv_bn(pg, oc[3], oc[3], 1),   # ASPPPooling 1x1
            "b4": make_conv_bn(pg, oc[4], oc[4], 1),   # plain 1x1 branch
            "proj": make_conv_bn(pg, 2 * cin, out_ch, 1),
        }

    return {
        "Conv1": conv_block_params(3, f[0]),
        "Conv2": conv_block_params(f[0], f[1]),
        "Conv3": conv_block_params(f[1], f[2]),
        "Conv4": conv_block_params(f[2], f[3]),
        "Conv5": conv_block_params(f[3], f[4]),
        "Up5": make_conv_bn(pg, f[4], f[3], 3, conv_bias=True),
        "Up_conv5": conv_block_params(f[4], f[3]),
        "Up4": make_conv_bn(pg, f[3], f[2], 3, conv_bias=True),
        "Up_conv4": conv_block_params(f[3], f[2]),
        "Up3": make_conv_bn(pg, f[2], f[1], 3, conv_bias=True),
        "Up_conv3": conv_block_params(f[2], f[1]),
        "Up2": make_conv_bn(pg, f[1], f[0], 3, conv_bias=True),
        "Up_conv2": conv_block_params(f[1], f[0]),
        "Conv": make_conv_bn(pg, f[0], 2, 1, conv_bias=True, bn=False),
        "dspp1": dspp_params(256, 256),
        "dspp2": dspp_params(128, 128),
        "dspp3": dspp_params(64, 64),
    }


# ----------------------------------------------------------------------------
# Module forward (NHWC inside, bf16 activations)
# ----------------------------------------------------------------------------
def conv_block_apply(p, x):
    x = conv2d(x, p["c1"]["w"], p["c1"]["scale"], p["c1"]["bias"], k=3, padding=1)
    x = conv2d(x, p["c2"]["w"], p["c2"]["scale"], p["c2"]["bias"], k=3, padding=1)
    return x


def up_conv_apply(p, x):
    # nn.Upsample(scale_factor=2) default mode == 'nearest'
    # TODO(synk): fold the nearest upsample into the conv's tap indexing
    # (4-phase sub-pixel conv) instead of materializing the 4x activation.
    x = jnp.repeat(jnp.repeat(x, 2, axis=1), 2, axis=2)
    return conv2d(x, p["w"], p["scale"], p["bias"], k=3, padding=1)


def maxpool2x2(x):
    n, h, w, c = x.shape
    return jnp.max(x.reshape(n, h // 2, 2, w // 2, 2, c), axis=(2, 4))


def dspp_apply(p, y):
    # TODO(synk): DefC (deformable conv) is undefined in the source; treated as
    # a standard dilated 3x3 Conv2d here.
    oc = p["oc"]
    n, h, w, _ = y.shape
    splits, start = [], 0
    for c in oc:
        splits.append(y[..., start:start + c])
        start += c
    r0 = conv2d(splits[0], p["b0"]["w"], p["b0"]["scale"], p["b0"]["bias"],
                k=3, padding=p["rates"][0], dilation=p["rates"][0])
    r1 = conv2d(splits[1], p["b1"]["w"], p["b1"]["scale"], p["b1"]["bias"],
                k=3, padding=p["rates"][1], dilation=p["rates"][1])
    r2 = conv2d(splits[2], p["b2"]["w"], p["b2"]["scale"], p["b2"]["bias"],
                k=3, padding=p["rates"][2], dilation=p["rates"][2])
    # ASPPPooling: global avg-pool -> 1x1 conv+BN+ReLU -> bilinear back; from a
    # 1x1 source that is spatially constant, so its contribution to the 1x1
    # projection is just a per-batch additive vector (never broadcast/concat).
    pooled = jnp.mean(splits[3].astype(jnp.float32), axis=(1, 2))        # (n, oc3)
    r3 = matmul_scale_bias(pooled, p["b3"]["w"], p["b3"]["scale"],
                           p["b3"]["bias"], relu=True, out_dtype=jnp.float32)
    r4 = conv2d(splits[4], p["b4"]["w"], p["b4"]["scale"], p["b4"]["bias"], k=1)

    # project(concat([r0,r1,r2,r3,r4,y])): split the projection weights so the
    # constant r3 branch is added after the matmul; Dropout(0.1) == identity.
    k3 = oc[0] + oc[1] + oc[2]
    w_all = p["proj"]["w"]
    w_r3 = w_all[k3:k3 + oc[3]]
    w_rest = jnp.concatenate([w_all[:k3], w_all[k3 + oc[3]:]], axis=0)
    # TODO(synk): fuse this concat into the projection's K-reduction instead of
    # materializing it.
    xa = jnp.concatenate([r0, r1, r2, r4, y], axis=-1)
    t = matmul_scale_bias(xa.reshape(n * h * w, xa.shape[-1]), w_rest,
                          p["proj"]["scale"], p["proj"]["bias"],
                          relu=False, out_dtype=jnp.float32)
    t = t.reshape(n, h, w, -1)
    c3 = jnp.dot(r3, w_r3.astype(jnp.float32)) * p["proj"]["scale"][None, :]
    out = jnp.maximum(t + c3[:, None, None, :], 0.0)
    return out.astype(jnp.bfloat16)


def unet_dspp_forward(P, x_nchw):
    x = jnp.transpose(x_nchw, (0, 2, 3, 1)).astype(jnp.bfloat16)  # NCHW -> NHWC
    e1 = conv_block_apply(P["Conv1"], x)
    e2 = conv_block_apply(P["Conv2"], maxpool2x2(e1))
    e3 = conv_block_apply(P["Conv3"], maxpool2x2(e2))
    e4 = conv_block_apply(P["Conv4"], maxpool2x2(e3))
    e5 = conv_block_apply(P["Conv5"], maxpool2x2(e4))

    e4 = dspp_apply(P["dspp1"], e4)
    e3 = dspp_apply(P["dspp2"], e3)
    e2 = dspp_apply(P["dspp3"], e2)

    # TODO(synk): fuse the skip-connection concats into the first conv's
    # K-reduction (split weights per operand) instead of materializing them.
    d5 = up_conv_apply(P["Up5"], e5)
    d5 = conv_block_apply(P["Up_conv5"], jnp.concatenate([e4, d5], axis=-1))
    d4 = up_conv_apply(P["Up4"], d5)
    d4 = conv_block_apply(P["Up_conv4"], jnp.concatenate([e3, d4], axis=-1))
    d3 = up_conv_apply(P["Up3"], d4)
    d3 = conv_block_apply(P["Up_conv3"], jnp.concatenate([e2, d3], axis=-1))
    d2 = up_conv_apply(P["Up2"], d3)
    d2 = conv_block_apply(P["Up_conv2"], jnp.concatenate([e1, d2], axis=-1))

    out = conv2d(d2, P["Conv"]["w"], P["Conv"]["scale"], P["Conv"]["bias"],
                 k=1, relu=False, out_dtype=jnp.float32)
    return jnp.transpose(out, (0, 3, 1, 2))  # NHWC -> NCHW


# ----------------------------------------------------------------------------
# Kernel probes: compile + numerically validate each Pallas path; on failure
# the network silently uses a correct fallback (XLA conv / dot, unfolded store).
# ----------------------------------------------------------------------------
def _probe_matmul():
    try:
        ka, kb = jax.random.split(jax.random.PRNGKey(321))
        A = jax.random.normal(ka, (300, 100), jnp.float32)   # ragged M/N edges
        B = jax.random.normal(kb, (100, 160), jnp.float32)
        s = jnp.linspace(0.5, 1.5, 160).astype(jnp.float32)
        c = jnp.linspace(-0.2, 0.2, 160).astype(jnp.float32)
        got = matmul_scale_bias(A, B, s, c, relu=True, out_dtype=jnp.float32)
        Ab = A.astype(jnp.bfloat16).astype(jnp.float32)
        Bb = B.astype(jnp.bfloat16).astype(jnp.float32)
        want = jnp.maximum(jnp.dot(Ab, Bb) * s + c, 0.0)
        return bool(jnp.max(jnp.abs(got - want)) < 0.05)
    except Exception:
        return False


def _probe_matmul_fold():
    try:
        ka, kb = jax.random.split(jax.random.PRNGKey(654))
        A = jax.random.normal(ka, (256, 96), jnp.float32)
        B = jax.random.normal(kb, (96, 64), jnp.float32)      # N<128 -> folded
        s = jnp.linspace(0.5, 1.5, 64).astype(jnp.float32)
        c = jnp.linspace(-0.2, 0.2, 64).astype(jnp.float32)
        got = matmul_scale_bias(A, B, s, c, relu=True, out_dtype=jnp.float32)
        Ab = A.astype(jnp.bfloat16).astype(jnp.float32)
        Bb = B.astype(jnp.bfloat16).astype(jnp.float32)
        want = jnp.maximum(jnp.dot(Ab, Bb) * s + c, 0.0)
        return bool(jnp.max(jnp.abs(got - want)) < 0.05)
    except Exception:
        return False


def _probe_flat(fold, single_buffer):
    try:
        kx, kw = jax.random.split(jax.random.PRNGKey(123))
        x = jax.random.normal(kx, (1, 12, 10, 32), jnp.float32)
        wgt = 0.1 * jax.random.normal(kw, (3, 3, 32, 32), jnp.float32)
        s = jnp.linspace(0.8, 1.2, 32).astype(jnp.float32)
        c = jnp.linspace(-0.1, 0.1, 32).astype(jnp.float32)
        d = 2
        got = conv3x3_same_flat(x, wgt.reshape(9, 32, 32), s, c, dilation=d,
                                relu=True, fold=fold,
                                single_buffer=single_buffer).astype(jnp.float32)
        xb = x.astype(jnp.bfloat16).astype(jnp.float32)
        wb = wgt.astype(jnp.bfloat16).astype(jnp.float32)
        ref = jax.lax.conv_general_dilated(
            xb, wb, window_strides=(1, 1), padding=((d, d), (d, d)),
            rhs_dilation=(d, d), dimension_numbers=("NHWC", "HWIO", "NHWC"),
            precision=jax.lax.Precision.HIGHEST)
        ref = jnp.maximum(ref * s + c, 0.0)
        return bool(jnp.max(jnp.abs(got - ref)) < 0.1)
    except Exception:
        return False


if __name__ == "__main__":
    # Validate the Pallas kernels; degrade gracefully if a path does not lower
    # or verify on this backend (keeps the run clean and correct).
    USE_PALLAS_MATMUL = _probe_matmul()
    USE_MATMUL_FOLD = USE_PALLAS_MATMUL and _probe_matmul_fold()
    if _probe_flat(fold=False, single_buffer=True):
        USE_FLAT_CONV, FLAT_SINGLE_BUF = True, True
    elif _probe_flat(fold=False, single_buffer=False):
        USE_FLAT_CONV, FLAT_SINGLE_BUF = True, False
    else:
        USE_FLAT_CONV = False
    USE_FLAT_FOLD = USE_FLAT_CONV and _probe_flat(fold=True,
                                                  single_buffer=FLAT_SINGLE_BUF)

    key = jax.random.PRNGKey(0)
    pkey, xkey = jax.random.split(key)
    params = init_unet_dspp(pkey)
    # batch=2, in_ch=3, spatial=32 (divisible by 2**4 for the 4 maxpools)
    x = jax.random.normal(xkey, (2, 3, 32, 32), jnp.float32)

    fwd = jax.jit(functools.partial(unet_dspp_forward, params))
    out = jax.block_until_ready(fwd(x))

    assert out.shape == (2, 2, 32, 32), out.shape
    assert bool(jnp.all(jnp.isfinite(out)))
    print("KERNEL_OK")
</pallas_src>

<mosaic_0001>
module attributes {stable_mosaic.version = 11 : i64} {
  func.func @_matmul_kernel(%arg0: i32, %arg1: i32, %arg2: i32, %arg3: memref<256x100xbf16, #tpu.memory_space<vmem>>, %arg4: memref<100x128xbf16, #tpu.memory_space<vmem>>, %arg5: memref<1x128xf32, #tpu.memory_space<vmem>>, %arg6: memref<1x128xf32, #tpu.memory_space<vmem>>, %arg7: memref<256x128xf32, #tpu.memory_space<vmem>>, %arg8: memref<256x128xf32, #tpu.memory_space<vmem>>) attributes {dimension_semantics = [#tpu.dimension_semantics<parallel>, #tpu.dimension_semantics<parallel>, #tpu.dimension_semantics<arbitrary>], iteration_bounds = array<i64: 2, 2, 1>, scalar_prefetch = 0 : i64, scratch_operands = 1 : i64, tpu.core_type = #tpu.core_type<tc>, window_params = [{transform_indices = @transform_0, window_bounds = array<i64: 256, 100>}, {transform_indices = @transform_1, window_bounds = array<i64: 100, 128>}, {transform_indices = @transform_2, window_bounds = array<i64: 1, 128>}, {transform_indices = @transform_3, window_bounds = array<i64: 1, 128>}, {transform_indices = @transform_4, window_bounds = array<i64: 256, 128>}]} {
    %c0_i32 = arith.constant 0 : i32
    %0 = arith.cmpi eq, %arg2, %c0_i32 : i32
    %1 = arith.extui %0 : i1 to i32
    %c0_i32_0 = arith.constant 0 : i32
    %2 = arith.cmpi ne, %1, %c0_i32_0 : i32
    scf.if %2 {
      %cst_10 = arith.constant 0.000000e+00 : f32
      %12 = vector.broadcast %cst_10 : f32 to vector<256x128xf32>
      %c0_11 = arith.constant 0 : index
      %c0_12 = arith.constant 0 : index
      %13 = vector.load %arg8[%c0_11, %c0_12] : memref<256x128xf32, #tpu.memory_space<vmem>>, vector<256x128xf32>
      tpu.vector_store %arg8[%c0_11, %c0_12], %12 {strides = array<i32>} : memref<256x128xf32, #tpu.memory_space<vmem>>, vector<256x128xf32>,
    } else {
    }
    %c0 = arith.constant 0 : index
    %c0_1 = arith.constant 0 : index
    %3 = vector.load %arg8[%c0, %c0_1] : memref<256x128xf32, #tpu.memory_space<vmem>>, vector<256x128xf32>
    %c0_2 = arith.constant 0 : index
    %c0_3 = arith.constant 0 : index
    %4 = vector.load %arg3[%c0_2, %c0_3] : memref<256x100xbf16, #tpu.memory_space<vmem>>, vector<256x100xbf16>
    %c0_4 = arith.constant 0 : index
    %c0_5 = arith.constant 0 : index
    %5 = vector.load %arg4[%c0_4, %c0_5] : memref<100x128xbf16, #tpu.memory_space<vmem>>, vector<100x128xbf16>
    %cst = arith.constant dense<0.000000e+00> : vector<256x128xf32>
    %6 = tpu.matmul %4, %5, %cst {dimension_numbers = #tpu.dot_dimension_numbers<[1], [0], [0], [1], [0, 0, 1, 1], [], []>} : vector<256x100xbf16>, vector<100x128xbf16>, vector<256x128xf32> -> vector<256x128xf32>
    %7 = arith.addf %3, %6 : vector<256x128xf32>
    %c0_6 = arith.constant 0 : index
    %c0_7 = arith.constant 0 : index
    %8 = vector.load %arg8[%c0_6, %c0_7] : memref<256x128xf32, #tpu.memory_space<vmem>>, vector<256x128xf32>
    tpu.vector_store %arg8[%c0_6, %c0_7], %7 {strides = array<i32>} : memref<256x128xf32, #tpu.memory_space<vmem>>, vector<256x128xf32>,
    %c0_i32_8 = arith.constant 0 : i32
    %9 = arith.cmpi eq, %arg2, %c0_i32_8 : i32
    %10 = arith.extui %9 : i1 to i32
    %c0_i32_9 = arith.constant 0 : i32
    %11 = arith.cmpi ne, %10, %c0_i32_9 : i32
    scf.if %11 {
      %c0_10 = arith.constant 0 : index
      %c0_11 = arith.constant 0 : index
      %12 = vector.load %arg8[%c0_10, %c0_11] : memref<256x128xf32, #tpu.memory_space<vmem>>, vector<256x128xf32>
      %c0_12 = arith.constant 0 : index
      %c0_13 = arith.constant 0 : index
      %13 = vector.load %arg5[%c0_12, %c0_13] : memref<1x128xf32, #tpu.memory_space<vmem>>, vector<1x128xf32>
      %14 = vector.broadcast %13 : vector<1x128xf32> to vector<256x128xf32>
      %15 = arith.mulf %12, %14 : vector<256x128xf32>
      %c0_14 = arith.constant 0 : index
      %c0_15 = arith.constant 0 : index
      %16 = vector.load %arg6[%c0_14, %c0_15] : memref<1x128xf32, #tpu.memory_space<vmem>>, vector<1x128xf32>
      %17 = vector.broadcast %16 : vector<1x128xf32> to vector<256x128xf32>
      %18 = arith.addf %15, %17 : vector<256x128xf32>
      %cst_16 = arith.constant 0.000000e+00 : f32
      %19 = vector.broadcast %cst_16 : f32 to vector<256x128xf32>
      %20 = arith.maximumf %18, %19 : vector<256x128xf32>
      %c0_17 = arith.constant 0 : index
      %c0_18 = arith.constant 0 : index
      %21 = vector.load %arg7[%c0_17, %c0_18] : memref<256x128xf32, #tpu.memory_space<vmem>>, vector<256x128xf32>
      tpu.vector_store %arg7[%c0_17, %c0_18], %20 {strides = array<i32>} : memref<256x128xf32, #tpu.memory_space<vmem>>, vector<256x128xf32>,
    } else {
    }
    return
  }
  func.func @transform_0(%arg0: i32, %arg1: i32, %arg2: i32) -> (i32, i32) {
    %c0_i32 = arith.constant 0 : i32
    return %arg0, %arg2 : i32, i32
  }
  func.func @transform_1(%arg0: i32, %arg1: i32, %arg2: i32) -> (i32, i32) {
    %c0_i32 = arith.constant 0 : i32
    return %arg2, %arg1 : i32, i32
  }
  func.func @transform_2(%arg0: i32, %arg1: i32, %arg2: i32) -> (i32, i32) {
    %c0_i32 = arith.constant 0 : i32
    %c0_i32_0 = arith.constant 0 : i32
    return %c0_i32, %arg1 : i32, i32
  }
  func.func @transform_3(%arg0: i32, %arg1: i32, %arg2: i32) -> (i32, i32) {
    %c0_i32 = arith.constant 0 : i32
    %c0_i32_0 = arith.constant 0 : i32
    return %c0_i32, %arg1 : i32, i32
  }
  func.func @transform_4(%arg0: i32, %arg1: i32, %arg2: i32) -> (i32, i32) {
    %c0_i32 = arith.constant 0 : i32
    return %arg0, %arg1 : i32, i32
  }
}

module attributes {stable_mosaic.version = 11 : i64} {
  func.func @_conv3x3_flat_kernel(%arg0: i32, %arg1: i32, %arg2: i32, %arg3: memref<1x236x32xbf16, #tpu.memory_space<vmem>>, %arg4: memref<9x32x32xbf16, #tpu.memory_space<vmem>>, %arg5: memref<1x32xf32, #tpu.memory_space<vmem>>, %arg6: memref<1x32xf32, #tpu.memory_space<vmem>>, %arg7: memref<1x168x32xbf16, #tpu.memory_space<vmem>>) attributes {dimension_semantics = [#tpu.dimension_semantics<parallel>, #tpu.dimension_semantics<parallel>, #tpu.dimension_semantics<parallel>], iteration_bounds = array<i64: 1, 1, 1>, scalar_prefetch = 0 : i64, scratch_operands = 0 : i64, tpu.core_type = #tpu.core_type<tc>, window_params = [{pipeline_mode = #tpu.pipeline_mode<synchronous>, transform_indices = @transform_0, window_bounds = array<i64: 1, 236, 32>}, {transform_indices = @transform_1, window_bounds = array<i64: 9, 32, 32>}, {transform_indices = @transform_2, window_bounds = array<i64: 1, 32>}, {transform_indices = @transform_3, window_bounds = array<i64: 1, 32>}, {transform_indices = @transform_4, window_bounds = array<i64: 1, 168, 32>}]} {
    %c168_i32 = arith.constant 168 : i32
    %0 = arith.muli %arg2, %c168_i32 : i32
    %1 = tpu.assume_multiple %0, 8 : i32
    %c0_i32 = arith.constant 0 : i32
    %2 = arith.addi %1, %c0_i32 : i32
    %c0 = arith.constant 0 : index
    %3 = arith.index_cast %2 : i32 to index
    %c0_0 = arith.constant 0 : index
    %4 = vector.load %arg3[%c0, %3, %c0_0] : memref<1x236x32xbf16, #tpu.memory_space<vmem>>, vector<1x168x32xbf16>
    %5 = vector.shape_cast %4 : vector<1x168x32xbf16> to vector<168x32xbf16>
    %c0_1 = arith.constant 0 : index
    %c0_2 = arith.constant 0 : index
    %c0_3 = arith.constant 0 : index
    %6 = vector.load %arg4[%c0_1, %c0_2, %c0_3] : memref<9x32x32xbf16, #tpu.memory_space<vmem>>, vector<1x32x32xbf16>
    %7 = vector.shape_cast %6 : vector<1x32x32xbf16> to vector<32x32xbf16>
    %cst = arith.constant dense<0.000000e+00> : vector<168x32xf32>
    %8 = tpu.matmul %5, %7, %cst {dimension_numbers = #tpu.dot_dimension_numbers<[1], [0], [0], [1], [0, 0, 1, 1], [], []>} : vector<168x32xbf16>, vector<32x32xbf16>, vector<168x32xf32> -> vector<168x32xf32>
    %c2_i32 = arith.constant 2 : i32
    %9 = arith.addi %1, %c2_i32 : i32
    %c0_4 = arith.constant 0 : index
    %10 = arith.index_cast %9 : i32 to index
    %c0_5 = arith.constant 0 : index
    %11 = vector.load %arg3[%c0_4, %10, %c0_5] : memref<1x236x32xbf16, #tpu.memory_space<vmem>>, vector<1x168x32xbf16>
    %12 = vector.shape_cast %11 : vector<1x168x32xbf16> to vector<168x32xbf16>
    %c1 = arith.constant 1 : index
    %c0_6 = arith.constant 0 : index
    %c0_7 = arith.constant 0 : index
    %13 = vector.load %arg4[%c1, %c0_6, %c0_7] : memref<9x32x32xbf16, #tpu.memory_space<vmem>>, vector<1x32x32xbf16>
    %14 = vector.shape_cast %13 : vector<1x32x32xbf16> to vector<32x32xbf16>
    %cst_8 = arith.constant dense<0.000000e+00> : vector<168x32xf32>
    %15 = tpu.matmul %12, %14, %cst_8 {dimension_numbers = #tpu.dot_dimension_numbers<[1], [0], [0], [1], [0, 0, 1, 1], [], []>} : vector<168x32xbf16>, vector<32x32xbf16>, vector<168x32xf32> -> vector<168x32xf32>
    %16 = arith.addf %8, %15 : vector<168x32xf32>
    %c4_i32 = arith.constant 4 : i32
    %17 = arith.addi %1, %c4_i32 : i32
    %c0_9 = arith.constant 0 : index
    %18 = arith.index_cast %17 : i32 to index
    %c0_10 = arith.constant 0 : index
    %19 = vector.load %arg3[%c0_9, %18, %c0_10] : memref<1x236x32xbf16, #tpu.memory_space<vmem>>, vector<1x168x32xbf16>
    %20 = vector.shape_cast %19 : vector<1x168x32xbf16> to vector<168x32xbf16>
    %c2 = arith.constant 2 : index
    %c0_11 = arith.constant 0 : index
    %c0_12 = arith.constant 0 : index
    %21 = vector.load %arg4[%c2, %c0_11, %c0_12] : memref<9x32x32xbf16, #tpu.memory_space<vmem>>, vector<1x32x32xbf16>
    %22 = vector.shape_cast %21 : vector<1x32x32xbf16> to vector<32x32xbf16>
    %cst_13 = arith.constant dense<0.000000e+00> : vector<168x32xf32>
    %23 = tpu.matmul %20, %22, %cst_13 {dimension_numbers = #tpu.dot_dimension_numbers<[1], [0], [0], [1], [0, 0, 1, 1], [], []>} : vector<168x32xbf16>, vector<32x32xbf16>, vector<168x32xf32> -> vector<168x32xf32>
    %24 = arith.addf %16, %23 : vector<168x32xf32>
    %c28_i32 = arith.constant 28 : i32
    %25 = arith.addi %1, %c28_i32 : i32
    %c0_14 = arith.constant 0 : index
    %26 = arith.index_cast %25 : i32 to index
    %c0_15 = arith.constant 0 : index
    %27 = vector.load %arg3[%c0_14, %26, %c0_15] : memref<1x236x32xbf16, #tpu.memory_space<vmem>>, vector<1x168x32xbf16>
    %28 = vector.shape_cast %27 : vector<1x168x32xbf16> to vector<168x32xbf16>
    %c3 = arith.constant 3 : index
    %c0_16 = arith.constant 0 : index
    %c0_17 = arith.constant 0 : index
    %29 = vector.load %arg4[%c3, %c0_16, %c0_17] : memref<9x32x32xbf16, #tpu.memory_space<vmem>>, vector<1x32x32xbf16>
    %30 = vector.shape_cast %29 : vector<1x32x32xbf16> to vector<32x32xbf16>
    %cst_18 = arith.constant dense<0.000000e+00> : vector<168x32xf32>
    %31 = tpu.matmul %28, %30, %cst_18 {dimension_numbers = #tpu.dot_dimension_numbers<[1], [0], [0], [1], [0, 0, 1, 1], [], []>} : vector<168x32xbf16>, vector<32x32xbf16>, vector<168x32xf32> -> vector<168x32xf32>
    %32 = arith.addf %24, %31 : vector<168x32xf32>
    %c30_i32 = arith.constant 30 : i32
    %33 = arith.addi %1, %c30_i32 : i32
    %c0_19 = arith.constant 0 : index
    %34 = arith.index_cast %33 : i32 to index
    %c0_20 = arith.constant 0 : index
    %35 = vector.load %arg3[%c0_19, %34, %c0_20] : memref<1x236x32xbf16, #tpu.memory_space<vmem>>, vector<1x168x32xbf16>
    %36 = vector.shape_cast %35 : vector<1x168x32xbf16> to vector<168x32xbf16>
    %c4 = arith.constant 4 : index
    %c0_21 = arith.constant 0 : index
    %c0_22 = arith.constant 0 : index
    %37 = vector.load %arg4[%c4, %c0_21, %c0_22] : memref<9x32x32xbf16, #tpu.memory_space<vmem>>, vector<1x32x32xbf16>
    %38 = vector.shape_cast %37 : vector<1x32x32xbf16> to vector<32x32xbf16>
    %cst_23 = arith.constant dense<0.000000e+00> : vector<168x32xf32>
    %39 = tpu.matmul %36, %38, %cst_23 {dimension_numbers = #tpu.dot_dimension_numbers<[1], [0], [0], [1], [0, 0, 1, 1], [], []>} : vector<168x32xbf16>, vector<32x32xbf16>, vector<168x32xf32> -> vector<168x32xf32>
    %40 = arith.addf %32, %39 : vector<168x32xf32>
    %c32_i32 = arith.constant 32 : i32
    %41 = arith.addi %1, %c32_i32 : i32
    %c0_24 = arith.constant 0 : index
    %42 = arith.index_cast %41 : i32 to index
    %c0_25 = arith.constant 0 : index
    %43 = vector.load %arg3[%c0_24, %42, %c0_25] : memref<1x236x32xbf16, #tpu.memory_space<vmem>>, vector<1x168x32xbf16>
    %44 = vector.shape_cast %43 : vector<1x168x32xbf16> to vector<168x32xbf16>
    %c5 = arith.constant 5 : index
    %c0_26 = arith.constant 0 : index
    %c0_27 = arith.constant 0 : index
    %45 = vector.load %arg4[%c5, %c0_26, %c0_27] : memref<9x32x32xbf16, #tpu.memory_space<vmem>>, vector<1x32x32xbf16>
    %46 = vector.shape_cast %45 : vector<1x32x32xbf16> to vector<32x32xbf16>
    %cst_28 = arith.constant dense<0.000000e+00> : vector<168x32xf32>
    %47 = tpu.matmul %44, %46, %cst_28 {dimension_numbers = #tpu.dot_dimension_numbers<[1], [0], [0], [1], [0, 0, 1, 1], [], []>} : vector<168x32xbf16>, vector<32x32xbf16>, vector<168x32xf32> -> vector<168x32xf32>
    %48 = arith.addf %40, %47 : vector<168x32xf32>
    %c56_i32 = arith.constant 56 : i32
    %49 = arith.addi %1, %c56_i32 : i32
    %c0_29 = arith.constant 0 : index
    %50 = arith.index_cast %49 : i32 to index
    %c0_30 = arith.constant 0 : index
    %51 = vector.load %arg3[%c0_29, %50, %c0_30] : memref<1x236x32xbf16, #tpu.memory_space<vmem>>, vector<1x168x32xbf16>
    %52 = vector.shape_cast %51 : vector<1x168x32xbf16> to vector<168x32xbf16>
    %c6 = arith.constant 6 : index
    %c0_31 = arith.constant 0 : index
    %c0_32 = arith.constant 0 : index
    %53 = vector.load %arg4[%c6, %c0_31, %c0_32] : memref<9x32x32xbf16, #tpu.memory_space<vmem>>, vector<1x32x32xbf16>
    %54 = vector.shape_cast %53 : vector<1x32x32xbf16> to vector<32x32xbf16>
    %cst_33 = arith.constant dense<0.000000e+00> : vector<168x32xf32>
    %55 = tpu.matmul %52, %54, %cst_33 {dimension_numbers = #tpu.dot_dimension_numbers<[1], [0], [0], [1], [0, 0, 1, 1], [], []>} : vector<168x32xbf16>, vector<32x32xbf16>, vector<168x32xf32> -> vector<168x32xf32>
    %56 = arith.addf %48, %55 : vector<168x32xf32>
    %c58_i32 = arith.constant 58 : i32
    %57 = arith.addi %1, %c58_i32 : i32
    %c0_34 = arith.constant 0 : index
    %58 = arith.index_cast %57 : i32 to index
    %c0_35 = arith.constant 0 : index
    %59 = vector.load %arg3[%c0_34, %58, %c0_35] : memref<1x236x32xbf16, #tpu.memory_space<vmem>>, vector<1x168x32xbf16>
    %60 = vector.shape_cast %59 : vector<1x168x32xbf16> to vector<168x32xbf16>
    %c7 = arith.constant 7 : index
    %c0_36 = arith.constant 0 : index
    %c0_37 = arith.constant 0 : index
    %61 = vector.load %arg4[%c7, %c0_36, %c0_37] : memref<9x32x32xbf16, #tpu.memory_space<vmem>>, vector<1x32x32xbf16>
    %62 = vector.shape_cast %61 : vector<1x32x32xbf16> to vector<32x32xbf16>
    %cst_38 = arith.constant dense<0.000000e+00> : vector<168x32xf32>
    %63 = tpu.matmul %60, %62, %cst_38 {dimension_numbers = #tpu.dot_dimension_numbers<[1], [0], [0], [1], [0, 0, 1, 1], [], []>} : vector<168x32xbf16>, vector<32x32xbf16>, vector<168x32xf32> -> vector<168x32xf32>
    %64 = arith.addf %56, %63 : vector<168x32xf32>
    %c60_i32 = arith.constant 60 : i32
    %65 = arith.addi %1, %c60_i32 : i32
    %c0_39 = arith.constant 0 : index
    %66 = arith.index_cast %65 : i32 to index
    %c0_40 = arith.constant 0 : index
    %67 = vector.load %arg3[%c0_39, %66, %c0_40] : memref<1x236x32xbf16, #tpu.memory_space<vmem>>, vector<1x168x32xbf16>
    %68 = vector.shape_cast %67 : vector<1x168x32xbf16> to vector<168x32xbf16>
    %c8 = arith.constant 8 : index
    %c0_41 = arith.constant 0 : index
    %c0_42 = arith.constant 0 : index
    %69 = vector.load %arg4[%c8, %c0_41, %c0_42] : memref<9x32x32xbf16, #tpu.memory_space<vmem>>, vector<1x32x32xbf16>
    %70 = vector.shape_cast %69 : vector<1x32x32xbf16> to vector<32x32xbf16>
    %cst_43 = arith.constant dense<0.000000e+00> : vector<168x32xf32>
    %71 = tpu.matmul %68, %70, %cst_43 {dimension_numbers = #tpu.dot_dimension_numbers<[1], [0], [0], [1], [0, 0, 1, 1], [], []>} : vector<168x32xbf16>, vector<32x32xbf16>, vector<168x32xf32> -> vector<168x32xf32>
    %72 = arith.addf %64, %71 : vector<168x32xf32>
    %c0_44 = arith.constant 0 : index
    %c0_45 = arith.constant 0 : index
    %73 = vector.load %arg5[%c0_44, %c0_45] : memref<1x32xf32, #tpu.memory_space<vmem>>, vector<1x32xf32>
    %74 = vector.broadcast %73 : vector<1x32xf32> to vector<168x32xf32>
    %75 = arith.mulf %72, %74 : vector<168x32xf32>
    %c0_46 = arith.constant 0 : index
    %c0_47 = arith.constant 0 : index
    %76 = vector.load %arg6[%c0_46, %c0_47] : memref<1x32xf32, #tpu.memory_space<vmem>>, vector<1x32xf32>
    %77 = vector.broadcast %76 : vector<1x32xf32> to vector<168x32xf32>
    %78 = arith.addf %75, %77 : vector<168x32xf32>
    %cst_48 = arith.constant 0.000000e+00 : f32
    %79 = vector.broadcast %cst_48 : f32 to vector<168x32xf32>
    %80 = arith.maximumf %78, %79 : vector<168x32xf32>
    %81 = arith.truncf %80 : vector<168x32xf32> to vector<168x32xbf16>
    %c0_49 = arith.constant 0 : index
    %c0_50 = arith.constant 0 : index
    %c0_51 = arith.constant 0 : index
    %82 = vector.load %arg7[%c0_49, %c0_50, %c0_51] : memref<1x168x32xbf16, #tpu.memory_space<vmem>>, vector<1x168x32xbf16>
    %83 = vector.shape_cast %82 : vector<1x168x32xbf16> to vector<168x32xbf16>
    %84 = vector.shape_cast %81 : vector<168x32xbf16> to vector<1x168x32xbf16>
    tpu.vector_store %arg7[%c0_49, %c0_50, %c0_51], %84 {strides = array<i32>} : memref<1x168x32xbf16, #tpu.memory_space<vmem>>, vector<1x168x32xbf16>,
    return
  }
  func.func @transform_0(%arg0: i32, %arg1: i32, %arg2: i32) -> (i32, i32, i32) {
    %c0_i32 = arith.constant 0 : i32
    %c0_i32_0 = arith.constant 0 : i32
    %c0_i32_1 = arith.constant 0 : i32
    return %arg0, %c0_i32, %c0_i32_0 : i32, i32, i32
  }
  func.func @transform_1(%arg0: i32, %arg1: i32, %arg2: i32) -> (i32, i32, i32) {
    %c0_i32 = arith.constant 0 : i32
    %c0_i32_0 = arith.constant 0 : i32
    %c0_i32_1 = arith.constant 0 : i32
    return %c0_i32, %c0_i32_0, %arg1 : i32, i32, i32
  }
  func.func @transform_2(%arg0: i32, %arg1: i32, %arg2: i32) -> (i32, i32) {
    %c0_i32 = arith.constant 0 : i32
    %c0_i32_0 = arith.constant 0 : i32
    return %c0_i32, %arg1 : i32, i32
  }
  func.func @transform_3(%arg0: i32, %arg1: i32, %arg2: i32) -> (i32, i32) {
    %c0_i32 = arith.constant 0 : i32
    %c0_i32_0 = arith.constant 0 : i32
    return %c0_i32, %arg1 : i32, i32
  }
  func.func @transform_4(%arg0: i32, %arg1: i32, %arg2: i32) -> (i32, i32, i32) {
    %c0_i32 = arith.constant 0 : i32
    return %arg0, %arg2, %arg1 : i32, i32, i32
  }
}

module attributes {stable_mosaic.version = 11 : i64} {
  func.func @_conv3x3_flat_kernel(%arg0: i32, %arg1: i32, %arg2: i32, %arg3: memref<1x236x32xbf16, #tpu.memory_space<vmem>>, %arg4: memref<9x32x32xbf16, #tpu.memory_space<vmem>>, %arg5: memref<1x32xf32, #tpu.memory_space<vmem>>, %arg6: memref<1x32xf32, #tpu.memory_space<vmem>>, %arg7: memref<1x168x32xbf16, #tpu.memory_space<vmem>>) attributes {dimension_semantics = [#tpu.dimension_semantics<parallel>, #tpu.dimension_semantics<parallel>, #tpu.dimension_semantics<parallel>], iteration_bounds = array<i64: 1, 1, 1>, scalar_prefetch = 0 : i64, scratch_operands = 0 : i64, tpu.core_type = #tpu.core_type<tc>, window_params = [{transform_indices = @transform_0, window_bounds = array<i64: 1, 236, 32>}, {transform_indices = @transform_1, window_bounds = array<i64: 9, 32, 32>}, {transform_indices = @transform_2, window_bounds = array<i64: 1, 32>}, {transform_indices = @transform_3, window_bounds = array<i64: 1, 32>}, {transform_indices = @transform_4, window_bounds = array<i64: 1, 168, 32>}]} {
    %c168_i32 = arith.constant 168 : i32
    %0 = arith.muli %arg2, %c168_i32 : i32
    %1 = tpu.assume_multiple %0, 8 : i32
    %c0_i32 = arith.constant 0 : i32
    %2 = arith.addi %1, %c0_i32 : i32
    %c0 = arith.constant 0 : index
    %3 = arith.index_cast %2 : i32 to index
    %c0_0 = arith.constant 0 : index
    %4 = vector.load %arg3[%c0, %3, %c0_0] : memref<1x236x32xbf16, #tpu.memory_space<vmem>>, vector<1x168x32xbf16>
    %5 = vector.shape_cast %4 : vector<1x168x32xbf16> to vector<168x32xbf16>
    %c0_1 = arith.constant 0 : index
    %c0_2 = arith.constant 0 : index
    %c0_3 = arith.constant 0 : index
    %6 = vector.load %arg4[%c0_1, %c0_2, %c0_3] : memref<9x32x32xbf16, #tpu.memory_space<vmem>>, vector<1x32x32xbf16>
    %7 = vector.shape_cast %6 : vector<1x32x32xbf16> to vector<32x32xbf16>
    %cst = arith.constant dense<0.000000e+00> : vector<168x32xf32>
    %8 = tpu.matmul %5, %7, %cst {dimension_numbers = #tpu.dot_dimension_numbers<[1], [0], [0], [1], [0, 0, 1, 1], [], []>} : vector<168x32xbf16>, vector<32x32xbf16>, vector<168x32xf32> -> vector<168x32xf32>
    %c2_i32 = arith.constant 2 : i32
    %9 = arith.addi %1, %c2_i32 : i32
    %c0_4 = arith.constant 0 : index
    %10 = arith.index_cast %9 : i32 to index
    %c0_5 = arith.constant 0 : index
    %11 = vector.load %arg3[%c0_4, %10, %c0_5] : memref<1x236x32xbf16, #tpu.memory_space<vmem>>, vector<1x168x32xbf16>
    %12 = vector.shape_cast %11 : vector<1x168x32xbf16> to vector<168x32xbf16>
    %c1 = arith.constant 1 : index
    %c0_6 = arith.constant 0 : index
    %c0_7 = arith.constant 0 : index
    %13 = vector.load %arg4[%c1, %c0_6, %c0_7] : memref<9x32x32xbf16, #tpu.memory_space<vmem>>, vector<1x32x32xbf16>
    %14 = vector.shape_cast %13 : vector<1x32x32xbf16> to vector<32x32xbf16>
    %cst_8 = arith.constant dense<0.000000e+00> : vector<168x32xf32>
    %15 = tpu.matmul %12, %14, %cst_8 {dimension_numbers = #tpu.dot_dimension_numbers<[1], [0], [0], [1], [0, 0, 1, 1], [], []>} : vector<168x32xbf16>, vector<32x32xbf16>, vector<168x32xf32> -> vector<168x32xf32>
    %16 = arith.addf %8, %15 : vector<168x32xf32>
    %c4_i32 = arith.constant 4 : i32
    %17 = arith.addi %1, %c4_i32 : i32
    %c0_9 = arith.constant 0 : index
    %18 = arith.index_cast %17 : i32 to index
    %c0_10 = arith.constant 0 : index
    %19 = vector.load %arg3[%c0_9, %18, %c0_10] : memref<1x236x32xbf16, #tpu.memory_space<vmem>>, vector<1x168x32xbf16>
    %20 = vector.shape_cast %19 : vector<1x168x32xbf16> to vector<168x32xbf16>
    %c2 = arith.constant 2 : index
    %c0_11 = arith.constant 0 : index
    %c0_12 = arith.constant 0 : index
    %21 = vector.load %arg4[%c2, %c0_11, %c0_12] : memref<9x32x32xbf16, #tpu.memory_space<vmem>>, vector<1x32x32xbf16>
    %22 = vector.shape_cast %21 : vector<1x32x32xbf16> to vector<32x32xbf16>
    %cst_13 = arith.constant dense<0.000000e+00> : vector<168x32xf32>
    %23 = tpu.matmul %20, %22, %cst_13 {dimension_numbers = #tpu.dot_dimension_numbers<[1], [0], [0], [1], [0, 0, 1, 1], [], []>} : vector<168x32xbf16>, vector<32x32xbf16>, vector<168x32xf32> -> vector<168x32xf32>
    %24 = arith.addf %16, %23 : vector<168x32xf32>
    %c28_i32 = arith.constant 28 : i32
    %25 = arith.addi %1, %c28_i32 : i32
    %c0_14 = arith.constant 0 : index
    %26 = arith.index_cast %25 : i32 to index
    %c0_15 = arith.constant 0 : index
    %27 = vector.load %arg3[%c0_14, %26, %c0_15] : memref<1x236x32xbf16, #tpu.memory_space<vmem>>, vector<1x168x32xbf16>
    %28 = vector.shape_cast %27 : vector<1x168x32xbf16> to vector<168x32xbf16>
    %c3 = arith.constant 3 : index
    %c0_16 = arith.constant 0 : index
    %c0_17 = arith.constant 0 : index
    %29 = vector.load %arg4[%c3, %c0_16, %c0_17] : memref<9x32x32xbf16, #tpu.memory_space<vmem>>, vector<1x32x32xbf16>
    %30 = vector.shape_cast %29 : vector<1x32x32xbf16> to vector<32x32xbf16>
    %cst_18 = arith.constant dense<0.000000e+00> : vector<168x32xf32>
    %31 = tpu.matmul %28, %30, %cst_18 {dimension_numbers = #tpu.dot_dimension_numbers<[1], [0], [0], [1], [0, 0, 1, 1], [], []>} : vector<168x32xbf16>, vector<32x32xbf16>, vector<168x32xf32> -> vector<168x32xf32>
    %32 = arith.addf %24, %31 : vector<168x32xf32>
    %c30_i32 = arith.constant 30 : i32
    %33 = arith.addi %1, %c30_i32 : i32
    %c0_19 = arith.constant 0 : index
    %34 = arith.index_cast %33 : i32 to index
    %c0_20 = arith.constant 0 : index
    %35 = vector.load %arg3[%c0_19, %34, %c0_20] : memref<1x236x32xbf16, #tpu.memory_space<vmem>>, vector<1x168x32xbf16>
    %36 = vector.shape_cast %35 : vector<1x168x32xbf16> to vector<168x32xbf16>
    %c4 = arith.constant 4 : index
    %c0_21 = arith.constant 0 : index
    %c0_22 = arith.constant 0 : index
    %37 = vector.load %arg4[%c4, %c0_21, %c0_22] : memref<9x32x32xbf16, #tpu.memory_space<vmem>>, vector<1x32x32xbf16>
    %38 = vector.shape_cast %37 : vector<1x32x32xbf16> to vector<32x32xbf16>
    %cst_23 = arith.constant dense<0.000000e+00> : vector<168x32xf32>
    %39 = tpu.matmul %36, %38, %cst_23 {dimension_numbers = #tpu.dot_dimension_numbers<[1], [0], [0], [1], [0, 0, 1, 1], [], []>} : vector<168x32xbf16>, vector<32x32xbf16>, vector<168x32xf32> -> vector<168x32xf32>
    %40 = arith.addf %32, %39 : vector<168x32xf32>
    %c32_i32 = arith.constant 32 : i32
    %41 = arith.addi %1, %c32_i32 : i32
    %c0_24 = arith.constant 0 : index
    %42 = arith.index_cast %41 : i32 to index
    %c0_25 = arith.constant 0 : index
    %43 = vector.load %arg3[%c0_24, %42, %c0_25] : memref<1x236x32xbf16, #tpu.memory_space<vmem>>, vector<1x168x32xbf16>
    %44 = vector.shape_cast %43 : vector<1x168x32xbf16> to vector<168x32xbf16>
    %c5 = arith.constant 5 : index
    %c0_26 = arith.constant 0 : index
    %c0_27 = arith.constant 0 : index
    %45 = vector.load %arg4[%c5, %c0_26, %c0_27] : memref<9x32x32xbf16, #tpu.memory_space<vmem>>, vector<1x32x32xbf16>
    %46 = vector.shape_cast %45 : vector<1x32x32xbf16> to vector<32x32xbf16>
    %cst_28 = arith.constant dense<0.000000e+00> : vector<168x32xf32>
    %47 = tpu.matmul %44, %46, %cst_28 {dimension_numbers = #tpu.dot_dimension_numbers<[1], [0], [0], [1], [0, 0, 1, 1], [], []>} : vector<168x32xbf16>, vector<32x32xbf16>, vector<168x32xf32> -> vector<168x32xf32>
    %48 = arith.addf %40, %47 : vector<168x32xf32>
    %c56_i32 = arith.constant 56 : i32
    %49 = arith.addi %1, %c56_i32 : i32
    %c0_29 = arith.constant 0 : index
    %50 = arith.index_cast %49 : i32 to index
    %c0_30 = arith.constant 0 : index
    %51 = vector.load %arg3[%c0_29, %50, %c0_30] : memref<1x236x32xbf16, #tpu.memory_space<vmem>>, vector<1x168x32xbf16>
    %52 = vector.shape_cast %51 : vector<1x168x32xbf16> to vector<168x32xbf16>
    %c6 = arith.constant 6 : index
    %c0_31 = arith.constant 0 : index
    %c0_32 = arith.constant 0 : index
    %53 = vector.load %arg4[%c6, %c0_31, %c0_32] : memref<9x32x32xbf16, #tpu.memory_space<vmem>>, vector<1x32x32xbf16>
    %54 = vector.shape_cast %53 : vector<1x32x32xbf16> to vector<32x32xbf16>
    %cst_33 = arith.constant dense<0.000000e+00> : vector<168x32xf32>
    %55 = tpu.matmul %52, %54, %cst_33 {dimension_numbers = #tpu.dot_dimension_numbers<[1], [0], [0], [1], [0, 0, 1, 1], [], []>} : vector<168x32xbf16>, vector<32x32xbf16>, vector<168x32xf32> -> vector<168x32xf32>
    %56 = arith.addf %48, %55 : vector<168x32xf32>
    %c58_i32 = arith.constant 58 : i32
    %57 = arith.addi %1, %c58_i32 : i32
    %c0_34 = arith.constant 0 : index
    %58 = arith.index_cast %57 : i32 to index
    %c0_35 = arith.constant 0 : index
    %59 = vector.load %arg3[%c0_34, %58, %c0_35] : memref<1x236x32xbf16, #tpu.memory_space<vmem>>, vector<1x168x32xbf16>
    %60 = vector.shape_cast %59 : vector<1x168x32xbf16> to vector<168x32xbf16>
    %c7 = arith.constant 7 : index
    %c0_36 = arith.constant 0 : index
    %c0_37 = arith.constant 0 : index
    %61 = vector.load %arg4[%c7, %c0_36, %c0_37] : memref<9x32x32xbf16, #tpu.memory_space<vmem>>, vector<1x32x32xbf16>
    %62 = vector.shape_cast %61 : vector<1x32x32xbf16> to vector<32x32xbf16>
    %cst_38 = arith.constant dense<0.000000e+00> : vector<168x32xf32>
    %63 = tpu.matmul %60, %62, %cst_38 {dimension_numbers = #tpu.dot_dimension_numbers<[1], [0], [0], [1], [0, 0, 1, 1], [], []>} : vector<168x32xbf16>, vector<32x32xbf16>, vector<168x32xf32> -> vector<168x32xf32>
    %64 = arith.addf %56, %63 : vector<168x32xf32>
    %c60_i32 = arith.constant 60 : i32
    %65 = arith.addi %1, %c60_i32 : i32
    %c0_39 = arith.constant 0 : index
    %66 = arith.index_cast %65 : i32 to index
    %c0_40 = arith.constant 0 : index
    %67 = vector.load %arg3[%c0_39, %66, %c0_40] : memref<1x236x32xbf16, #tpu.memory_space<vmem>>, vector<1x168x32xbf16>
    %68 = vector.shape_cast %67 : vector<1x168x32xbf16> to vector<168x32xbf16>
    %c8 = arith.constant 8 : index
    %c0_41 = arith.constant 0 : index
    %c0_42 = arith.constant 0 : index
    %69 = vector.load %arg4[%c8, %c0_41, %c0_42] : memref<9x32x32xbf16, #tpu.memory_space<vmem>>, vector<1x32x32xbf16>
    %70 = vector.shape_cast %69 : vector<1x32x32xbf16> to vector<32x32xbf16>
    %cst_43 = arith.constant dense<0.000000e+00> : vector<168x32xf32>
    %71 = tpu.matmul %68, %70, %cst_43 {dimension_numbers = #tpu.dot_dimension_numbers<[1], [0], [0], [1], [0, 0, 1, 1], [], []>} : vector<168x32xbf16>, vector<32x32xbf16>, vector<168x32xf32> -> vector<168x32xf32>
    %72 = arith.addf %64, %71 : vector<168x32xf32>
    %c0_44 = arith.constant 0 : index
    %c0_45 = arith.constant 0 : index
    %73 = vector.load %arg5[%c0_44, %c0_45] : memref<1x32xf32, #tpu.memory_space<vmem>>, vector<1x32xf32>
    %74 = vector.broadcast %73 : vector<1x32xf32> to vector<168x32xf32>
    %75 = arith.mulf %72, %74 : vector<168x32xf32>
    %c0_46 = arith.constant 0 : index
    %c0_47 = arith.constant 0 : index
    %76 = vector.load %arg6[%c0_46, %c0_47] : memref<1x32xf32, #tpu.memory_space<vmem>>, vector<1x32xf32>
    %77 = vector.broadcast %76 : vector<1x32xf32> to vector<168x32xf32>
    %78 = arith.addf %75, %77 : vector<168x32xf32>
    %cst_48 = arith.constant 0.000000e+00 : f32
    %79 = vector.broadcast %cst_48 : f32 to vector<168x32xf32>
    %80 = arith.maximumf %78, %79 : vector<168x32xf32>
    %81 = arith.truncf %80 : vector<168x32xf32> to vector<168x32xbf16>
    %c0_49 = arith.constant 0 : index
    %c0_50 = arith.constant 0 : index
    %c0_51 = arith.constant 0 : index
    %82 = vector.load %arg7[%c0_49, %c0_50, %c0_51] : memref<1x168x32xbf16, #tpu.memory_space<vmem>>, vector<1x168x32xbf16>
    %83 = vector.shape_cast %82 : vector<1x168x32xbf16> to vector<168x32xbf16>
    %84 = vector.shape_cast %81 : vector<168x32xbf16> to vector<1x168x32xbf16>
    tpu.vector_store %arg7[%c0_49, %c0_50, %c0_51], %84 {strides = array<i32>} : memref<1x168x32xbf16, #tpu.memory_space<vmem>>, vector<1x168x32xbf16>,
    return
  }
  func.func @transform_0(%arg0: i32, %arg1: i32, %arg2: i32) -> (i32, i32, i32) {
    %c0_i32 = arith.constant 0 : i32
    %c0_i32_0 = arith.constant 0 : i32
    %c0_i32_1 = arith.constant 0 : i32
    return %arg0, %c0_i32, %c0_i32_0 : i32, i32, i32
  }
  func.func @transform_1(%arg0: i32, %arg1: i32, %arg2: i32) -> (i32, i32, i32) {
    %c0_i32 = arith.constant 0 : i32
    %c0_i32_0 = arith.constant 0 : i32
    %c0_i32_1 = arith.constant 0 : i32
    return %c0_i32, %c0_i32_0, %arg1 : i32, i32, i32
  }
  func.func @transform_2(%arg0: i32, %arg1: i32, %arg2: i32) -> (i32, i32) {
    %c0_i32 = arith.constant 0 : i32
    %c0_i32_0 = arith.constant 0 : i32
    return %c0_i32, %arg1 : i32, i32
  }
  func.func @transform_3(%arg0: i32, %arg1: i32, %arg2: i32) -> (i32, i32) {
    %c0_i32 = arith.constant 0 : i32
    %c0_i32_0 = arith.constant 0 : i32
    return %c0_i32, %arg1 : i32, i32
  }
  func.func @transform_4(%arg0: i32, %arg1: i32, %arg2: i32) -> (i32, i32, i32) {
    %c0_i32 = arith.constant 0 : i32
    return %arg0, %arg2, %arg1 : i32, i32, i32
  }
}

</mosaic_0001>

<bundles_post_ra>
// kernel: tpu_custom_call.1
= control target key start
LH: loop header
LB: loop body
LE: loop exit
PB: predicated region body
PF: predicated region fallthrough
CT: control target
= control target key end

     0   :  { %s1961_s15 = smov 0   ;;  %s1963_s16 = smov 0   ;;  %s2369_s0 = inlined_call_operand.vmem [shape: bf16[300,100], index: 0, kind: input, shape index: {}]   ;;  %s2370_s1 = inlined_call_operand.vmem [shape: bf16[100,160], index: 1, kind: input, shape index: {}]   ;;  %s2371_s2 = inlined_call_operand.vmem [shape: f32[1,160], index: 2, kind: input, shape index: {}]   ;;  %s2372_s3 = inlined_call_operand.vmem [shape: f32[1,160], index: 3, kind: input, shape index: {}]   ;;  %s2373_s4 = inlined_call_operand.vmem [shape: f32[300,160], index: 4, kind: output, shape index: {}]  }
   0x1   :  { %s1965_s17 = smov 0   ;;  %s1967_s18 = smov 0  }
   0x2   :  { %s1969_s19 = smov 0   ;;  %s1971_s20 = smov 0  }
   0x3   :  { %s1973_s21 = smov 0   ;;  %s1975_s22 = smov 0  }
   0x4   :  { %s1977_s23 = smov 0  }
   0x5 LB: > { %s1483_s24 = sadd.s32 4294967295, %s1902_s23   ;;  %s29_s25 = sadd.s32 1, %s1894_s21  ;;  %s1902_s23 = sphi %s1977_s23, %s14_s23   ;;  %s1898_s22 = sphi %s1975_s22, %s2387_s22   ;;  %s1894_s21 = sphi %s1973_s21, %s2386_s21   ;;  %s1890_s20 = sphi %s1971_s20, %s2385_s20   ;;  %s1886_s19 = sphi %s1969_s19, %s2384_s19   ;;  %s1882_s18 = sphi %s1967_s18, %s2383_s18   ;;  %s1878_s17 = sphi %s1965_s17, %s2382_s17   ;;  %s1874_s16 = sphi %s1963_s16, %s2381_s16   ;;  %s1870_s15 = sphi %s1961_s15, %s2380_s15  }
   0x6   : > { %p31_p0 = scmp.ge.s32.totalorder %s29_s25, 2  ;;  %s33_s26 = sadd.s32 1, %s1898_s22 }
   0x7   : > { %s70_s27 = sadd.s32 1, %s1882_s18  ;;  %p77_p1 = scmp.ne.s32.totalorder %s1882_s18, %s1878_s17 }
   0x8   : > { %s2389_s25 = smov (%p31_p0, %s29_s25), 0  ;;  %s2391_s26 = smov (!%p31_p0, %s33_s26), %s1898_s22 }
   0x9   : > { %s66_s28 = ssub.s32 %s1894_s21, %s2389_s25  ;;  %p78_p2 = scmp.eq.s32.totalorder %s1902_s23, 0 }
   0xa   : > { %p35_p3 = scmp.ge.s32.totalorder %s2391_s26, 2  ;;  %p68_p4 = scmp.eq.s32.totalorder %s66_s28, 0 }
   0xb   : > { %p79_p5 = por %p78_p2, %p77_p1  ;;  %s150_s29 = sadd.s32 1, %s1874_s16 }
   0xc   : > { %s2393_s26 = smov (%p35_p3, %s2391_s26), 0  ;;  %p160_p6 = scmp.ne.s32.totalorder %s1874_s16, %s1870_s15 }
   0xd   : > { %s2022_s30 = scalar_select %p68_p4, %s1882_s18, %s70_s27  }
   0xe   : > { %s145_s5 = ssub.s32 %s1898_s22, %s2393_s26  ;;  %p161_p7 = scmp.eq.s32.totalorder %s1483_s24, 3 }
   0xf   : > { %s147_s6 = sor.u32 %s145_s5, %s66_s28  ;;  %p1486_p10 = scmp.ge.s32.totalorder %s1902_s23, 4 }
  0x10   : > { %p148_p8 = scmp.eq.s32.totalorder %s147_s6, 0  ;;  %p2028_p9 = por %p161_p7, %p160_p6 }
  0x11   : > { %183 = sbr.rel (%p1486_p10) target bundleno = 35 (0x23), region = 16 }
  0x12   : > { %s2033_s8 = scalar_select %p148_p8, %s1874_s16, %s150_s29  }
  0x16   : > { %206 = sbr.rel (!%p79_p5) target bundleno = 35 (0x23), region = 24  ;;  %s208_s9 = sand.u32 (%p79_p5), 1, %s1882_s18  }
  0x17   : > { %s1487_s10 = sshll.u32 (%p79_p5), %s1894_s21, 2  ;;  %s1639_s11 = smul.u32 (%p79_p5), 52, %s208_s9 }
  0x18   : > { %s215_s14 = scalar_lea.vmem (%p79_p5), %s2370_s1, %s1487_s10 }
  0x19   : > { %v232_v0 = vld [vmem:[%s215_s14] sm:$0xf] (%p79_p5)  ;;  %v234_v1 = vld [vmem:[%s215_s14 + $0x8] sm:$0xf] (%p79_p5)  ;;  %v236_v2 = vld [vmem:[%s215_s14 + $0x10] sm:$0xf] (%p79_p5) }
  0x1a   : > { %v238_v3 = vld [vmem:[%s215_s14 + $0x18] sm:$0xf] (%p79_p5)  ;;  %v240_v4 = vld [vmem:[%s215_s14 + $0x20] sm:$0xf] (%p79_p5)  ;;  %s210_s24 = scalar_lea.vmem (%p79_p5), [#allocation3], %s1639_s11 }
  0x1b   : > { %233 = vst [vmem:[%s210_s24] sm:$0xf] %v232_v0  ;;  %235 = vst [vmem:[%s210_s24 + $0x4] sm:$0xf] %v234_v1  ;;  %v242_v5 = vld [vmem:[%s215_s14 + $0x28] sm:$0xf] }
  0x1c   : > { %237 = vst [vmem:[%s210_s24 + $0x8] sm:$0xf] %v236_v2  ;;  %239 = vst [vmem:[%s210_s24 + $0xc] sm:$0xf] %v238_v3  ;;  %v244_v6 = vld [vmem:[%s215_s14 + $0x30] sm:$0xf] }
  0x1d   : > { %241 = vst [vmem:[%s210_s24 + $0x10] sm:$0xf] %v240_v4  ;;  %v246_v7 = vld [vmem:[%s215_s14 + $0x38] sm:$0xf]  ;;  %243 = vst [vmem:[%s210_s24 + $0x14] sm:$0xf] %v242_v5 }
  0x1e   : > { %245 = vst [vmem:[%s210_s24 + $0x18] sm:$0xf] %v244_v6  ;;  %247 = vst [vmem:[%s210_s24 + $0x1c] sm:$0xf] %v246_v7  ;;  %v248_v8 = vld [vmem:[%s215_s14 + $0x40] sm:$0xf] }
  0x1f   : > { %v250_v9 = vld [vmem:[%s215_s14 + $0x48] sm:$0xf]  ;;  %v252_v10 = vld [vmem:[%s215_s14 + $0x50] sm:$0xf]  ;;  %249 = vst [vmem:[%s210_s24 + $0x20] sm:$0xf] %v248_v8 }
  0x20   : > { %251 = vst [vmem:[%s210_s24 + $0x24] sm:$0xf] %v250_v9  ;;  %253 = vst [vmem:[%s210_s24 + $0x28] sm:$0xf] %v252_v10  ;;  %v254_v11 = vld [vmem:[%s215_s14 + $0x58] sm:$0xf] }
  0x21   : > { %v256_v12 = vld [vmem:[%s215_s14 + $0x60] sm:$0xf]  ;;  %255 = vst [vmem:[%s210_s24 + $0x2c] sm:$0xf] %v254_v11 }
  0x22   : > { %257 = vst [vmem:[%s210_s24 + $0x30] sm:$0xf] %v256_v12 }
  0x23 PF: > { %p1488_p11 = scmp.ge.s32.totalorder %s1902_s23, 1  ;;  %p318_p12 = scmp.lt.s32.totalorder %s1902_s23, 5 }
  0x25   : > { %p319_p13 = pnand %p1488_p11, %p318_p12 }
  0x26   : > { %s325_s27 = sand.u32 (!%p319_p13), 1, %s1878_s17   ;;  %s2045_s28 = sshll.u32 (!%p319_p13), %s1890_s20, 5 }
  0x27   : > { %322 = sbr.rel (%p319_p13) target bundleno = 351 (0x15f), region = 73  ;;  %p372_p0 = scmp.lt.s32.totalorder (!%p319_p13), %s2045_s28, 37 }
  0x28   : > { %s1640_s29 = smul.u32 (!%p319_p13), 52, %s325_s27  ;;  %p385_p1 = scmp.lt.s32.totalorder (!%p319_p13), %s1886_s19, 1 }
  0x2a   : > { %s2048_s5 = scalar_lea.vmem (!%p319_p13), [#allocation3], %s1640_s29 }
  0x2c   : > { %vm678_vm0 = vcmask 1041408   ;;  %v1777_v13 = vld [vmem:[%s2048_s5 + $0x30] ss:$0 sps:$4 sm:$0x33]   ;;  %v1778_v14 = vld [vmem:[%s2048_s5 + $0x28] sm:$0xff]   ;;  %s373_s17 = scalar_select %p372_p0, %s2045_s28, 37 }
  0x2d   : > { %1637 = vmatprep.subr.msk.bf16.mxu0 %vm678_vm0, %v1777_v13  ;;  %1638 = vmatprep.subr.msk.bf16.mxu1 %vm678_vm0, %v1777_v13  ;;  %v680_v15 = vsel %vm678_vm0, %v1777_v13, 0  ;;  %v1779_v16 = vld [vmem:[%s2048_s5 + $0x20] sm:$0xff]   ;;  %v1780_v17 = vld [vmem:[%s2048_s5 + $0x18] sm:$0xff]   ;;  %vm629_vm1 = vcmask 818176   ;;  %v1781_v20 = vld [vmem:[%s2048_s5 + $0x10] sm:$0xff]   ;;  %s386_s12 = scalar_select %p385_p1, %s1886_s19, 1 }
  0x2e   : > { %1578 = vmatpush3.bf16.msra.mxu0 %v680_v15  ;;  %1630 = vmatpush3.bf16.msra.mxu1 %v680_v15  ;;  %s1491_s6 = sshll.u32 %s373_s17, 2  ;;  %v1782_v21 = vld [vmem:[%s2048_s5 + $0x8] sm:$0xff]   ;;  %v1783_v22 = vld [vmem:[%s2048_s5] sm:$0xff]   ;;  %s364_s17 = sand.u32 1, %s1870_s15  }
  0x2f   : > { %1579 = vmatprep.subr.bf16.mxu0 %v1778_v14  ;;  %1624 = vmatprep.subr.bf16.mxu1 %v1778_v14  ;;  %s2058_s11 = scalar_lea.vmem %s2369_s0, %s1491_s6  ;;  %s387_s24 = scalar_lea.vmem %s2371_s2, %s386_s12 }
  0x30   : > { %v1784_v18 = vld [vmem:[%s2058_s11] sm:$0xff]   ;;  %v1786_v23 = vld [vmem:[%s2058_s11 + $0x8] sm:$0xff]   ;;  %v1788_v25 = vld [vmem:[%s2058_s11 + $0x10] sm:$0xff]   ;;  %s390_s5 = scalar_lea.vmem %s2372_s3, %s386_s12  ;;  %s1489_s6 = sshll.u32 %s364_s17, 8 }
  0x31   : > { %v1785_v19 = vld [vmem:[%s2058_s11 + $0x40] sm:$0xff]   ;;  %1591 = vmatprep.mubr.msk.bf16.mxu0 %vm629_vm1, %v1784_v18  ;;  %v1787_v24 = vld [vmem:[%s2058_s11 + $0x48] sm:$0xff]   ;;  %v1789_v26 = vld [vmem:[%s2058_s11 + $0x50] sm:$0xff]   ;;  %s2118_s15 = scalar_lea.vmem [#allocation4], %s1489_s6   ;;  %s1092_s9 = ssub.s32 (%p2028_p9), 38, %s2045_s28 }
  0x32   : > { %1580 = vmatpush3.bf16.msra.mxu0 %v1778_v14  ;;  %1631 = vmatpush3.bf16.msra.mxu1 %v1778_v14  ;;  %v1790_v27 = vld [vmem:[%s2058_s11 + $0x18] sm:$0xff]   ;;  %v1792_v29 = vld [vmem:[%s2058_s11 + $0x20] sm:$0xff]   ;;  %v1794_v31 = vld [vmem:[%s2058_s11 + $0x28] sm:$0xff]   ;;  %s1551_s10 = sshll.u32 (%p2028_p9), %s1890_s20, 6  ;;  %p1093_p2 = scmp.lt.s32.totalorder (%p2028_p9), %s1092_s9, 32 }
  0x33   : > { %1581 = vmatprep.subr.bf16.mxu0 %v1779_v16  ;;  %1625 = vmatprep.subr.bf16.mxu1 %v1779_v16  ;;  %v1791_v28 = vld [vmem:[%s2058_s11 + $0x58] sm:$0xff]   ;;  %v1793_v30 = vld [vmem:[%s2058_s11 + $0x60] sm:$0xff]   ;;  %v1795_v32 = vld [vmem:[%s2058_s11 + $0x68] sm:$0xff]  }
  0x34   : > { %1607 = vmatprep.mubr.msk.bf16.mxu1 %vm629_vm1, %v1785_v19  ;;  %v1796_v33 = vld [vmem:[%s2058_s11 + $0x30] sm:$0xff]   ;;  %v1798_v35 = vld [vmem:[%s2058_s11 + $0x38] sm:$0xff]   ;;  %v2104_v37 = vld [vmem:[%s387_s24] ss:$0 sm:$0xff] }
  0x35   : > { %v1797_v34 = vld [vmem:[%s2058_s11 + $0x70] sm:$0xff]   ;;  %v1799_v36 = vld [vmem:[%s2058_s11 + $0x78] sm:$0xff]   ;;  %v2106_v39 = vld [vmem:[%s390_s5] ss:$0 sm:$0xff]  ;;  %s1098_s11 = sadd.s32 (%p2028_p9), %s1886_s19, %s1551_s10 }
  0x36   : > { %1582 = vmatpush3.bf16.msra.mxu0 %v1779_v16  ;;  %1632 = vmatpush3.bf16.msra.mxu1 %v1779_v16  ;;  %s1538_s12 = sshll.u32 (%p2028_p9), %s1098_s11, 3 }
  0x37   : > { %1583 = vmatprep.subr.bf16.mxu0 %v1780_v17  ;;  %1626 = vmatprep.subr.bf16.mxu1 %v1780_v17  ;;  %s2216_s24 = scalar_lea.vmem (%p2028_p9), %s2373_s4, %s1538_s12  }
  0x3a   : > { %1584 = vmatpush3.bf16.msra.mxu0 %v1780_v17  ;;  %1633 = vmatpush3.bf16.msra.mxu1 %v1780_v17 }
  0x3b   : > { %1585 = vmatprep.subr.bf16.mxu0 %v1781_v20  ;;  %1627 = vmatprep.subr.bf16.mxu1 %v1781_v20 }
  0x3e   : > { %1586 = vmatpush3.bf16.msra.mxu0 %v1781_v20  ;;  %1634 = vmatpush3.bf16.msra.mxu1 %v1781_v20 }
  0x3f   : > { %1587 = vmatprep.subr.bf16.mxu0 %v1782_v21  ;;  %1628 = vmatprep.subr.bf16.mxu1 %v1782_v21 }
  0x42   : > { %1588 = vmatpush3.bf16.msra.mxu0 %v1782_v21  ;;  %1635 = vmatpush3.bf16.msra.mxu1 %v1782_v21 }
  0x43   : > { %1589 = vmatprep.subr.bf16.mxu0 %v1783_v22  ;;  %1629 = vmatprep.subr.bf16.mxu1 %v1783_v22 }
  0x46   : > { %1590 = vmatpush3.bf16.msra.mxu0 %v1783_v22  ;;  %1636 = vmatpush3.bf16.msra.mxu1 %v1783_v22 }
  0x49   : > { %1592 = vmatmul.mubr.msk.bf16.vlgmr.msra.gmra.mxu0 %vm629_vm1, %v1786_v23  ;;  %1608 = vmatmul.mubr.msk.bf16.vlgmr.msra.gmra.mxu1 %vm629_vm1, %v1787_v24 }
  0x4a   : > { %1595 = vmatprep.mubr.msk.bf16.mxu0 %vm629_vm1, %v1788_v25  ;;  %1611 = vmatprep.mubr.msk.bf16.mxu1 %vm629_vm1, %v1789_v26 }
  0x51   : > { %1596 = vmatmul.mubr.msk.bf16.gmra.mxu0 %vm629_vm1, %v1790_v27  ;;  %1612 = vmatmul.mubr.msk.bf16.gmra.mxu1 %vm629_vm1, %v1791_v28 }
  0x52   : > { %1599 = vmatprep.mubr.msk.bf16.mxu0 %vm629_vm1, %v1792_v29  ;;  %1615 = vmatprep.mubr.msk.bf16.mxu1 %vm629_vm1, %v1793_v30 }
  0x59   : > { %1600 = vmatmul.mubr.msk.bf16.gmra.mxu0 %vm629_vm1, %v1794_v31  ;;  %1616 = vmatmul.mubr.msk.bf16.gmra.mxu1 %vm629_vm1, %v1795_v32 }
  0x5a   : > { %1603 = vmatprep.mubr.msk.bf16.mxu0 %vm629_vm1, %v1796_v33  ;;  %1619 = vmatprep.mubr.msk.bf16.mxu1 %vm629_vm1, %v1797_v34 }
  0x61   : > { %1604 = vmatmul.mubr.msk.bf16.gmra.mxu0 %vm629_vm1, %v1798_v35  ;;  %1620 = vmatmul.mubr.msk.bf16.gmra.mxu1 %vm629_vm1, %v1799_v36 }
 0x109   : > { %v1593_v38 = vpop.f32.mrf.mxu0  ;;  %v1609_v40 = vpop.f32.mrf.mxu1 }
 0x10a   : > { %v951_v41 = vmul.f32 %v1593_v38, %v2104_v37  ;;  %v967_v42 = vmul.f32 %v1609_v40, %v2104_v37 }
 0x10b   : > { %v716_v43 = vpop.f32.mrf.mxu0  ;;  %v780_v44 = vpop.f32.mrf.mxu1 }
 0x10c   : > { %v990_v45 = vadd.f32 %v2106_v39, %v951_v41  ;;  %v1006_v46 = vadd.f32 %v2106_v39, %v967_v42  ;;  %v949_v47 = vmul.f32 %v2104_v37, %v716_v43  ;;  %v965_v48 = vmul.f32 %v2104_v37, %v780_v44 }
 0x10d   : > { %v1594_v49 = vpop.f32.mrf.mxu0  ;;  %v1610_v50 = vpop.f32.mrf.mxu1 }
 0x10e   : > { %v1022_v51 = vmax.f32 %v990_v45, 0.0  ;;  %v1038_v52 = vmax.f32 %v1006_v46, 0.0  ;;  %v988_v53 = vadd.f32 %v2106_v39, %v949_v47  ;;  %v1004_v54 = vadd.f32 %v2106_v39, %v965_v48 }
 0x10f   : > { %v952_v55 = vmul.f32 %v1594_v49, %v2104_v37  ;;  %v968_v56 = vmul.f32 %v1610_v50, %v2104_v37  ;;  %v719_v57 = vpop.f32.mrf.mxu0  ;;  %v783_v58 = vpop.f32.mrf.mxu1 }
 0x110   : > { %1054 = vst [vmem:[%s2118_s15 + $0x10] sm:$0xff] %v1022_v51  ;;  %1070 = vst [vmem:[%s2118_s15 + $0x90] sm:$0xff] %v1038_v52  ;;  %v1020_v59 = vmax.f32 %v988_v53, 0.0  ;;  %v1036_v60 = vmax.f32 %v1004_v54, 0.0  ;;  %v950_v61 = vmul.f32 %v2104_v37, %v719_v57  ;;  %v966_v62 = vmul.f32 %v2104_v37, %v783_v58 }
 0x111   : > { %v991_v63 = vadd.f32 %v2106_v39, %v952_v55  ;;  %v1007_v0 = vadd.f32 %v2106_v39, %v968_v56  ;;  %v1597_v1 = vpop.f32.mrf.mxu0  ;;  %v1613_v2 = vpop.f32.mrf.mxu1 }
 0x112   : > { %1052 = vst [vmem:[%s2118_s15] sm:$0xff] %v1020_v59  ;;  %1068 = vst [vmem:[%s2118_s15 + $0x80] sm:$0xff] %v1036_v60  ;;  %v989_v3 = vadd.f32 %v2106_v39, %v950_v61  ;;  %v1005_v4 = vadd.f32 %v2106_v39, %v966_v62  ;;  %v955_v5 = vmul.f32 %v1597_v1, %v2104_v37 }
 0x113   : > { %v971_v6 = vmul.f32 %v1613_v2, %v2104_v37  ;;  %v1023_v7 = vmax.f32 %v991_v63, 0.0  ;;  %v1039_v8 = vmax.f32 %v1007_v0, 0.0  ;;  %v732_v9 = vpop.f32.mrf.mxu0  ;;  %v796_v10 = vpop.f32.mrf.mxu1 }
 0x114   : > { %v1021_v11 = vmax.f32 %v989_v3, 0.0  ;;  %v1037_v12 = vmax.f32 %v1005_v4, 0.0  ;;  %v994_v13 = vadd.f32 %v2106_v39, %v955_v5  ;;  %v953_v15 = vmul.f32 %v2104_v37, %v732_v9 }
 0x115   : > { %v1010_v14 = vadd.f32 %v2106_v39, %v971_v6  ;;  %1055 = vst [vmem:[%s2118_s15 + $0x18] sm:$0xff] %v1023_v7  ;;  %1071 = vst [vmem:[%s2118_s15 + $0x98] sm:$0xff] %v1039_v8  ;;  %v969_v16 = vmul.f32 %v2104_v37, %v796_v10  ;;  %v1598_v17 = vpop.f32.mrf.mxu0  ;;  %v1614_v18 = vpop.f32.mrf.mxu1 }
 0x116   : > { %1053 = vst [vmem:[%s2118_s15 + $0x8] sm:$0xff] %v1021_v11  ;;  %1069 = vst [vmem:[%s2118_s15 + $0x88] sm:$0xff] %v1037_v12  ;;  %v1026_v19 = vmax.f32 %v994_v13, 0.0  ;;  %v956_v21 = vmul.f32 %v1598_v17, %v2104_v37  ;;  %v972_v22 = vmul.f32 %v1614_v18, %v2104_v37  ;;  %v992_v23 = vadd.f32 %v2106_v39, %v953_v15 }
 0x117   : > { %v1042_v20 = vmax.f32 %v1010_v14, 0.0  ;;  %v1008_v24 = vadd.f32 %v2106_v39, %v969_v16  ;;  %v735_v25 = vpop.f32.mrf.mxu0  ;;  %v799_v26 = vpop.f32.mrf.mxu1 }
 0x118   : > { %1058 = vst [vmem:[%s2118_s15 + $0x30] sm:$0xff] %v1026_v19  ;;  %v995_v27 = vadd.f32 %v2106_v39, %v956_v21  ;;  %v1011_v28 = vadd.f32 %v2106_v39, %v972_v22  ;;  %v954_v29 = vmul.f32 %v2104_v37, %v735_v25  ;;  %v970_v30 = vmul.f32 %v2104_v37, %v799_v26 }
 0x119   : > { %1074 = vst [vmem:[%s2118_s15 + $0xb0] sm:$0xff] %v1042_v20  ;;  %v1024_v31 = vmax.f32 %v992_v23, 0.0  ;;  %v1040_v32 = vmax.f32 %v1008_v24, 0.0  ;;  %v1601_v33 = vpop.f32.mrf.mxu0  ;;  %v1617_v34 = vpop.f32.mrf.mxu1 }
 0x11a   : > { %v1027_v35 = vmax.f32 %v995_v27, 0.0  ;;  %v1043_v36 = vmax.f32 %v1011_v28, 0.0  ;;  %v993_v38 = vadd.f32 %v2106_v39, %v954_v29  ;;  %v1009_v40 = vadd.f32 %v2106_v39, %v970_v30 }
 0x11b   : > { %1056 = vst [vmem:[%s2118_s15 + $0x20] sm:$0xff] %v1024_v31  ;;  %1072 = vst [vmem:[%s2118_s15 + $0xa0] sm:$0xff] %v1040_v32  ;;  %v959_v41 = vmul.f32 %v1601_v33, %v2104_v37  ;;  %v975_v42 = vmul.f32 %v1617_v34, %v2104_v37  ;;  %v748_v43 = vpop.f32.mrf.mxu0  ;;  %v812_v44 = vpop.f32.mrf.mxu1 }
 0x11c   : > { %1059 = vst [vmem:[%s2118_s15 + $0x38] sm:$0xff] %v1027_v35  ;;  %1075 = vst [vmem:[%s2118_s15 + $0xb8] sm:$0xff] %v1043_v36  ;;  %v1025_v45 = vmax.f32 %v993_v38, 0.0  ;;  %v1041_v46 = vmax.f32 %v1009_v40, 0.0  ;;  %v957_v47 = vmul.f32 %v2104_v37, %v748_v43  ;;  %v973_v48 = vmul.f32 %v2104_v37, %v812_v44 }
 0x11d   : > { %v998_v49 = vadd.f32 %v2106_v39, %v959_v41  ;;  %v1014_v50 = vadd.f32 %v2106_v39, %v975_v42  ;;  %v1602_v51 = vpop.f32.mrf.mxu0  ;;  %v1618_v52 = vpop.f32.mrf.mxu1 }
 0x11e   : > { %1057 = vst [vmem:[%s2118_s15 + $0x28] sm:$0xff] %v1025_v45  ;;  %1073 = vst [vmem:[%s2118_s15 + $0xa8] sm:$0xff] %v1041_v46  ;;  %v996_v53 = vadd.f32 %v2106_v39, %v957_v47  ;;  %v1012_v54 = vadd.f32 %v2106_v39, %v973_v48  ;;  %v960_v55 = vmul.f32 %v1602_v51, %v2104_v37 }
 0x11f   : > { %v976_v56 = vmul.f32 %v1618_v52, %v2104_v37  ;;  %v1030_v57 = vmax.f32 %v998_v49, 0.0  ;;  %v1046_v58 = vmax.f32 %v1014_v50, 0.0  ;;  %v751_v59 = vpop.f32.mrf.mxu0  ;;  %v815_v60 = vpop.f32.mrf.mxu1 }
 0x120   : > { %v1028_v61 = vmax.f32 %v996_v53, 0.0  ;;  %v1044_v62 = vmax.f32 %v1012_v54, 0.0  ;;  %v999_v63 = vadd.f32 %v2106_v39, %v960_v55  ;;  %v958_v1 = vmul.f32 %v2104_v37, %v751_v59 }
 0x121   : > { %v1015_v0 = vadd.f32 %v2106_v39, %v976_v56  ;;  %1062 = vst [vmem:[%s2118_s15 + $0x50] sm:$0xff] %v1030_v57  ;;  %1078 = vst [vmem:[%s2118_s15 + $0xd0] sm:$0xff] %v1046_v58  ;;  %v974_v2 = vmul.f32 %v2104_v37, %v815_v60  ;;  %v1605_v3 = vpop.f32.mrf.mxu0  ;;  %v1621_v4 = vpop.f32.mrf.mxu1 }
 0x122   : > { %1060 = vst [vmem:[%s2118_s15 + $0x40] sm:$0xff] %v1028_v61  ;;  %1076 = vst [vmem:[%s2118_s15 + $0xc0] sm:$0xff] %v1044_v62  ;;  %v1031_v5 = vmax.f32 %v999_v63, 0.0  ;;  %v963_v7 = vmul.f32 %v1605_v3, %v2104_v37  ;;  %v979_v8 = vmul.f32 %v1621_v4, %v2104_v37  ;;  %v997_v9 = vadd.f32 %v2106_v39, %v958_v1 }
 0x123   : > { %v1047_v6 = vmax.f32 %v1015_v0, 0.0  ;;  %v1013_v10 = vadd.f32 %v2106_v39, %v974_v2  ;;  %v764_v11 = vpop.f32.mrf.mxu0  ;;  %v828_v12 = vpop.f32.mrf.mxu1 }
 0x124   : > { %1063 = vst [vmem:[%s2118_s15 + $0x58] sm:$0xff] %v1031_v5  ;;  %v1002_v13 = vadd.f32 %v2106_v39, %v963_v7  ;;  %v1018_v14 = vadd.f32 %v2106_v39, %v979_v8  ;;  %v961_v15 = vmul.f32 %v2104_v37, %v764_v11  ;;  %v977_v16 = vmul.f32 %v2104_v37, %v828_v12 }
 0x125   : > { %1079 = vst [vmem:[%s2118_s15 + $0xd8] sm:$0xff] %v1047_v6  ;;  %v1029_v17 = vmax.f32 %v997_v9, 0.0  ;;  %v1045_v18 = vmax.f32 %v1013_v10, 0.0  ;;  %v1606_v19 = vpop.f32.mrf.mxu0  ;;  %v1622_v20 = vpop.f32.mrf.mxu1 }
 0x126   : > { %v1034_v21 = vmax.f32 %v1002_v13, 0.0  ;;  %v1050_v22 = vmax.f32 %v1018_v14, 0.0  ;;  %v1000_v23 = vadd.f32 %v2106_v39, %v961_v15  ;;  %v1016_v24 = vadd.f32 %v2106_v39, %v977_v16 }
 0x127   : > { %1061 = vst [vmem:[%s2118_s15 + $0x48] sm:$0xff] %v1029_v17  ;;  %1077 = vst [vmem:[%s2118_s15 + $0xc8] sm:$0xff] %v1045_v18  ;;  %v964_v25 = vmul.f32 %v1606_v19, %v2104_v37  ;;  %v980_v26 = vmul.f32 %v1622_v20, %v2104_v37  ;;  %v767_v27 = vpop.f32.mrf.mxu0  ;;  %v831_v28 = vpop.f32.mrf.mxu1 }
 0x128   : > { %1066 = vst [vmem:[%s2118_s15 + $0x70] sm:$0xff] %v1034_v21  ;;  %1082 = vst [vmem:[%s2118_s15 + $0xf0] sm:$0xff] %v1050_v22  ;;  %v1032_v29 = vmax.f32 %v1000_v23, 0.0  ;;  %v1048_v30 = vmax.f32 %v1016_v24, 0.0  ;;  %v962_v31 = vmul.f32 %v2104_v37, %v767_v27  ;;  %v978_v32 = vmul.f32 %v2104_v37, %v831_v28 }
 0x129   : > { %v1003_v33 = vadd.f32 %v2106_v39, %v964_v25  ;;  %v1019_v34 = vadd.f32 %v2106_v39, %v980_v26 }
 0x12a   : > { %1064 = vst [vmem:[%s2118_s15 + $0x60] sm:$0xff] %v1032_v29  ;;  %1080 = vst [vmem:[%s2118_s15 + $0xe0] sm:$0xff] %v1048_v30  ;;  %v1001_v35 = vadd.f32 %v2106_v39, %v962_v31  ;;  %v1017_v36 = vadd.f32 %v2106_v39, %v978_v32  ;;  %1090 = sbr.rel (!%p2028_p9) target bundleno = 351 (0x15f), region = 89 }
 0x12b   : > { %v1035_v38 = vmax.f32 %v1003_v33, 0.0  ;;  %v1051_v40 = vmax.f32 %v1019_v34, 0.0 }
 0x12c   : > { %v1033_v41 = vmax.f32 %v1001_v35, 0.0  ;;  %v1049_v42 = vmax.f32 %v1017_v36, 0.0 }
 0x12d   : > { %1067 = vst [vmem:[%s2118_s15 + $0x78] sm:$0xff] %v1035_v38  ;;  %1083 = vst [vmem:[%s2118_s15 + $0xf8] sm:$0xff] %v1051_v40 }
 0x12e   : > { %1065 = vst [vmem:[%s2118_s15 + $0x68] sm:$0xff] %v1033_v41  ;;  %1081 = vst [vmem:[%s2118_s15 + $0xe8] sm:$0xff] %v1049_v42 }
 0x12f   : > { %s2395_s9 = smov (!%p1093_p2, %s1092_s9), 32 }
 0x130   : > { %s1535_s27 = sshll.u32 %s2395_s9, 7 }
 0x131   : > { %p1539_p3 = scmp.eq.s32.totalorder %s1535_s27, 0 }
 0x132   : > { %s2220_s7 = sshrl.u32 (!%p1539_p3), %s2395_s9, 5 }
 0x133   : > { %1103 = sbr.rel (%p1539_p3) target bundleno = 351 (0x15f), region = 93  ;;  %p1540_p4 = scmp.le.s32.totalorder (!%p1539_p3), %s2220_s7, 0 }
 0x138   : > { %1407 = sbr.rel (%p1540_p4) target bundleno = 334 (0x14e), region = 183  ;;  %s2375_s19 = smov (!%p1540_p4), %s2216_s24 }
 0x139   : > { %s2376_s20 = smov (!%p1540_p4), %s2118_s15  ;;  %s2229_s28 = smov (!%p1540_p4), 0  }
 0x13a   : > { %s2231_s29 = smov (!%p1540_p4), 0  }
 0x13d LB: >> { %v1228_v37 = vld [vmem:[%s1910_s20] sm:$0xff]  ;;  %v1230_v39 = vld [vmem:[%s1910_s20 + $0x8] sm:$0xff]  ;;  %v1232_v43 = vld [vmem:[%s1910_s20 + $0x10] sm:$0xff]  ;;  %s1292_s5 = sadd.s32 1, %s1914_s28  ;;  %s1222_s29 = sadd.s32 1, %s1918_s29   ;;  %s1918_s29 = sphi %s2231_s29, %s1222_s29   ;;  %s1914_s28 = sphi %s2229_s28, %s2379_s28   ;;  %s1910_s20 = sphi %s2376_s20, %s2378_s20   ;;  %s1906_s19 = sphi %s2375_s19, %s2377_s19  }
 0x13e   : >> { %1229 = vst [vmem:[%s1906_s19] sm:$0xff] %v1228_v37  ;;  %1231 = vst [vmem:[%s1906_s19 + $0x10] sm:$0xff] %v1230_v39  ;;  %v1234_v44 = vld [vmem:[%s1910_s20 + $0x18] sm:$0xff]  ;;  %v1236_v45 = vld [vmem:[%s1910_s20 + $0x20] sm:$0xff]  ;;  %p1293_p5 = scmp.ge.s32.totalorder %s1292_s5, %s2220_s7  ;;  %p1221_p6 = scmp.ge.s32.totalorder %s1222_s29, %s2220_s7 }
 0x13f   : >> { %1233 = vst [vmem:[%s1906_s19 + $0x20] sm:$0xff] %v1232_v43  ;;  %v1238_v46 = vld [vmem:[%s1910_s20 + $0x28] sm:$0xff]  ;;  %1235 = vst [vmem:[%s1906_s19 + $0x30] sm:$0xff] %v1234_v44  ;;  %v1240_v47 = vld [vmem:[%s1910_s20 + $0x30] sm:$0xff] }
 0x140   : >> { %1237 = vst [vmem:[%s1906_s19 + $0x40] sm:$0xff] %v1236_v45  ;;  %1239 = vst [vmem:[%s1906_s19 + $0x50] sm:$0xff] %v1238_v46  ;;  %v1242_v48 = vld [vmem:[%s1910_s20 + $0x38] sm:$0xff]  ;;  %v1244_v49 = vld [vmem:[%s1910_s20 + $0x40] sm:$0xff]  ;;  %s2397_s5 = smov (%p1293_p5, %s1292_s5), 0 }
 0x141   : >> { %1241 = vst [vmem:[%s1906_s19 + $0x60] sm:$0xff] %v1240_v47  ;;  %1243 = vst [vmem:[%s1906_s19 + $0x70] sm:$0xff] %v1242_v48  ;;  %v1246_v50 = vld [vmem:[%s1910_s20 + $0x48] sm:$0xff]  ;;  %v1248_v51 = vld [vmem:[%s1910_s20 + $0x50] sm:$0xff]  ;;  %s1541_s17 = sshll.u32 %s2397_s5, 8  ;;  %s1542_s6 = sshll.u32 %s2397_s5, 9 }
 0x142   : >> { %1245 = vst [vmem:[%s1906_s19 + $0x80] sm:$0xff] %v1244_v49  ;;  %v1250_v52 = vld [vmem:[%s1910_s20 + $0x58] sm:$0xff]  ;;  %1247 = vst [vmem:[%s1906_s19 + $0x90] sm:$0xff] %v1246_v50  ;;  %v1252_v53 = vld [vmem:[%s1910_s20 + $0x60] sm:$0xff]  ;;  %s2288_s10 = scalar_lea.vmem %s2118_s15, %s1541_s17 [#allocation4]   ;;  %s1298_s11 = scalar_lea.vmem %s2216_s24, %s1542_s6  }
 0x143   : >> { %1249 = vst [vmem:[%s1906_s19 + $0xa0] sm:$0xff] %v1248_v51  ;;  %1251 = vst [vmem:[%s1906_s19 + $0xb0] sm:$0xff] %v1250_v52  ;;  %v1254_v54 = vld [vmem:[%s1910_s20 + $0x68] sm:$0xff]  ;;  %v1256_v55 = vld [vmem:[%s1910_s20 + $0x70] sm:$0xff]  ;;  %s2379_s28 = smov %s2397_s5 }
 0x144   : >> { %1253 = vst [vmem:[%s1906_s19 + $0xc0] sm:$0xff] %v1252_v53  ;;  %1255 = vst [vmem:[%s1906_s19 + $0xd0] sm:$0xff] %v1254_v54  ;;  %v1258_v56 = vld [vmem:[%s1910_s20 + $0x78] sm:$0xff]  ;;  %v1260_v57 = vld [vmem:[%s1910_s20 + $0x80] sm:$0xff] }
 0x145   : >> { %1257 = vst [vmem:[%s1906_s19 + $0xe0] sm:$0xff] %v1256_v55  ;;  %v1262_v58 = vld [vmem:[%s1910_s20 + $0x88] sm:$0xff]  ;;  %1259 = vst [vmem:[%s1906_s19 + $0xf0] sm:$0xff] %v1258_v56  ;;  %v1264_v59 = vld [vmem:[%s1910_s20 + $0x90] sm:$0xff] }
 0x146   : >> { %1261 = vst [vmem:[%s1906_s19 + $0x100] sm:$0xff] %v1260_v57  ;;  %1263 = vst [vmem:[%s1906_s19 + $0x110] sm:$0xff] %v1262_v58  ;;  %v1266_v60 = vld [vmem:[%s1910_s20 + $0x98] sm:$0xff]  ;;  %v1268_v61 = vld [vmem:[%s1910_s20 + $0xa0] sm:$0xff] }
 0x147   : >> { %1265 = vst [vmem:[%s1906_s19 + $0x120] sm:$0xff] %v1264_v59  ;;  %1267 = vst [vmem:[%s1906_s19 + $0x130] sm:$0xff] %v1266_v60  ;;  %v1270_v62 = vld [vmem:[%s1910_s20 + $0xa8] sm:$0xff]  ;;  %v1272_v63 = vld [vmem:[%s1910_s20 + $0xb0] sm:$0xff] }
 0x148   : >> { %1269 = vst [vmem:[%s1906_s19 + $0x140] sm:$0xff] %v1268_v61  ;;  %v1274_v0 = vld [vmem:[%s1910_s20 + $0xb8] sm:$0xff]  ;;  %1271 = vst [vmem:[%s1906_s19 + $0x150] sm:$0xff] %v1270_v62  ;;  %v1276_v1 = vld [vmem:[%s1910_s20 + $0xc0] sm:$0xff] }
 0x149   : >> { %1273 = vst [vmem:[%s1906_s19 + $0x160] sm:$0xff] %v1272_v63  ;;  %1275 = vst [vmem:[%s1906_s19 + $0x170] sm:$0xff] %v1274_v0  ;;  %v1278_v2 = vld [vmem:[%s1910_s20 + $0xc8] sm:$0xff]  ;;  %v1280_v3 = vld [vmem:[%s1910_s20 + $0xd0] sm:$0xff]  ;;  %1224 = sbr.rel (!%p1221_p6) target bundleno = 317 (0x13d), region = 189 }
 0x14a   : >> { %1277 = vst [vmem:[%s1906_s19 + $0x180] sm:$0xff] %v1276_v1  ;;  %1279 = vst [vmem:[%s1906_s19 + $0x190] sm:$0xff] %v1278_v2  ;;  %v1282_v4 = vld [vmem:[%s1910_s20 + $0xd8] sm:$0xff]  ;;  %v1284_v5 = vld [vmem:[%s1910_s20 + $0xe0] sm:$0xff] }
 0x14b   : >> { %1281 = vst [vmem:[%s1906_s19 + $0x1a0] sm:$0xff] %v1280_v3  ;;  %v1286_v6 = vld [vmem:[%s1910_s20 + $0xe8] sm:$0xff]  ;;  %1283 = vst [vmem:[%s1906_s19 + $0x1b0] sm:$0xff] %v1282_v4  ;;  %v1288_v7 = vld [vmem:[%s1910_s20 + $0xf0] sm:$0xff] }
 0x14c   : >> { %1285 = vst [vmem:[%s1906_s19 + $0x1c0] sm:$0xff] %v1284_v5  ;;  %1287 = vst [vmem:[%s1906_s19 + $0x1d0] sm:$0xff] %v1286_v6  ;;  %v1290_v8 = vld [vmem:[%s1910_s20 + $0xf8] sm:$0xff]  ;;  %s2378_s20 = smov %s2288_s10 }
 0x14d   : >> { %1289 = vst [vmem:[%s1906_s19 + $0x1e0] sm:$0xff] %v1288_v7  ;;  %1291 = vst [vmem:[%s1906_s19 + $0x1f0] sm:$0xff] %v1290_v8  ;;  %s2377_s19 = smov %s1298_s11 }
 0x14e PF: > { %s2329_s12 = sand.u32 31, %s2395_s9   ;;  %s1552_s13 = sshll.u32 %s2220_s7, 8 }
 0x14f   : > { %s2333_s14 = scalar_lea.vmem %s2118_s15, %s1552_s13 [#allocation4]   ;;  %s1553_s27 = sshll.u32 %s2220_s7, 9 }
 0x150   : > { %s1305_s17 = scalar_lea.vmem %s2216_s24, %s1553_s27   ;;  %p1546_p7 = scmp.le.s32.totalorder %s2329_s12, 0 }
 0x151   : > { %s1920_s5 = smov (!%p1546_p7), %s1305_s17   ;;  %s1924_s29 = smov (!%p1546_p7), %s2333_s14  }
 0x152   : > { %1421 = sbr.rel (%p1546_p7) target bundleno = 351 (0x15f), region = 194  ;;  %s1928_s6 = smov (!%p1546_p7), 0  }
 0x153   : > { %s1932_s19 = smov (!%p1546_p7), 0  }
 0x157 LB: >> { %v1315_v9 = vld [vmem:[%s1926_s29] sm:$0xff]  ;;  %s1317_s15 = sadd.s32 1, %s1930_s6  ;;  %s1309_s19 = sadd.s32 1, %s1934_s19   ;;  %s1934_s19 = sphi %s1932_s19, %s1309_s19   ;;  %s1930_s6 = sphi %s1928_s6, %s1929_s6   ;;  %s1926_s29 = sphi %s1924_s29, %s1322_s29   ;;  %s1922_s5 = sphi %s1920_s5, %s1323_s5  }
 0x158   : >> { %1316 = vst [vmem:[%s1922_s5] sm:$0xff] %v1315_v9  ;;  %p1318_p8 = scmp.ge.s32.totalorder %s1317_s15, %s2329_s12  ;;  %p1308_p9 = scmp.ge.s32.totalorder %s1309_s19, %s2329_s12 }
 0x15a   : >> { %s2399_s15 = smov (%p1318_p8, %s1317_s15), 0  ;;  %1311 = sbr.rel (!%p1308_p9) target bundleno = 343 (0x157), region = 200 }
 0x15b   : >> { %s1547_s9 = sshll.u32 %s2399_s15, 3  ;;  %s1548_s24 = sshll.u32 %s2399_s15, 4 }
 0x15c   : >> { %s1322_s29 = scalar_lea.vmem %s2333_s14, %s1547_s9 [#allocation4]   ;;  %s1323_s5 = scalar_lea.vmem %s1305_s17, %s1548_s24  }
 0x15d   : >> { %s1929_s6 = smov %s2399_s15  }
 0x15f PF: > { %s14_s23 = sadd.s32 1, %s1902_s23   ;;  %s2380_s15 = smov %s1874_s16 }
 0x160   : > { %p11_p10 = scmp.ge.s32.totalorder %s14_s23, 6   ;;  %s2381_s16 = smov %s2033_s8 }
 0x161   : > { %s2382_s17 = smov %s1882_s18  ;;  %s2383_s18 = smov %s2022_s30 }
 0x162   : > { %s2384_s19 = smov %s1894_s21  ;;  %s2385_s20 = smov %s1898_s22 }
 0x163   : > { %s2386_s21 = smov %s2389_s25  ;;  %s2387_s22 = smov %s2393_s26 }
 0x164   :  { %13 = sbr.rel (!%p11_p10) target bundleno = 5 (0x5), region = 211 }

</bundles_post_ra>
